<compile_context>
chip_gen: v6e
topology: v6e:2x2x1
jax: 0.10.0
libtpu: 0.0.40
codegen_flags: <defaults>
</compile_context>

<pallas_src>
import functools
import math

import jax
import jax.numpy as jnp
from jax import lax
from jax.experimental import pallas as pl
from jax.experimental.pallas import tpu as pltpu


def _encoder_layer_kernel(x_ref,
                          wq_ref, bq_ref, wk_ref, bk_ref, wv_ref, bv_ref,
                          w1_ref, b1_ref, w2_ref, b2_ref,
                          gamma_ref, beta_ref,
                          o_ref,
                          *, bt, num_heads, dim_qk, dim_v, eps, compute_dtype):
    L = x_ref.shape[1]
    D = x_ref.shape[2]
    R = bt * L                       # rows processed per grid step
    H = num_heads
    dh_qk = dim_qk // H
    dh_v = dim_v // H
    cdt = compute_dtype              # bf16 operands for every MXU matmul

    # Hoisted single reads of the small f32 parameters (biases / LN affine).
    bq = bq_ref[0]
    bk = bk_ref[0]
    bv = bv_ref[0]
    b1 = b1_ref[0]
    b2 = b2_ref[0]
    gamma = gamma_ref[0]
    beta = beta_ref[0]

    # [Bt, L, D] -> [Bt*L, D]; L is the full sequence so this is a cheap
    # sublane-contiguous reshape.
    x2d = x_ref[...].reshape(R, D)

    # ---- QKV projections: bf16 operands, f32 accumulation ----
    # (1/sqrt(dim_qk) is folded into wq/bq; the module's x+x doubling into wv/bv.)
    q = jnp.dot(x2d, wq_ref[...], preferred_element_type=jnp.float32) + bq
    k = jnp.dot(x2d, wk_ref[...], preferred_element_type=jnp.float32) + bk
    v = jnp.dot(x2d, wv_ref[...], preferred_element_type=jnp.float32) + bv

    # ---- Head-batched attention (single einsum per matmul, no per-head loop) ----
    # [R, H*dh] -> [Bt, L, H, dh] -> [Bt, H, L, dh] -> [Bt*H, L, dh]
    def to_heads(t, dh):
        t = t.reshape(bt, L, H, dh)
        t = jnp.swapaxes(t, 1, 2)
        return t.reshape(bt * H, L, dh)

    qh = to_heads(q.astype(cdt), dh_qk)
    kh = to_heads(k.astype(cdt), dh_qk)
    vh = to_heads(v.astype(cdt), dh_v)

    # scores [G, L, L] in f32 (scale pre-folded into q)
    s = jnp.einsum('gld,gmd->glm', qh, kh, preferred_element_type=jnp.float32)
    s_max = jnp.max(s, axis=-1, keepdims=True)
    p = jnp.exp(s - s_max)
    denom = jnp.sum(p, axis=-1, keepdims=True)
    p = p * pl.reciprocal(denom, approx=True)       # EUP slot, effectively free

    o = jnp.einsum('glm,gmd->gld', p.astype(cdt), vh,
                   preferred_element_type=jnp.float32)
    # Because wv/bv were doubled on the host, this already equals
    # x2 = attn_out + attn_out from the PyTorch forward.
    # [Bt*H, L, dh_v] -> [Bt, H, L, dh_v] -> [Bt, L, H, dh_v] -> [R, dim_v]
    x2 = jnp.swapaxes(o.reshape(bt, H, L, dh_v), 1, 2).reshape(R, dim_v)

    # ---- FeedForward: Linear -> exact (erf) GELU -> Linear; dropout = identity ----
    h1 = jnp.dot(x2.astype(cdt), w1_ref[...],
                 preferred_element_type=jnp.float32) + b1
    h1 = 0.5 * h1 * (1.0 + lax.erf(h1 * 0.7071067811865476))
    ff = jnp.dot(h1.astype(cdt), w2_ref[...],
                 preferred_element_type=jnp.float32) + b2
    y = ff + x2

    # ---- LayerNorm over the feature dim (biased variance), f32 math ----
    mean = jnp.mean(y, axis=-1, keepdims=True)
    var = jnp.mean((y - mean) * (y - mean), axis=-1, keepdims=True)
    out = (y - mean) * lax.rsqrt(var + eps) * gamma + beta

    o_ref[...] = out.reshape(bt, L, D).astype(o_ref.dtype)


def _choose_batch_tile(B, L, D, dim_qk, dim_v, mlp_dim, num_heads,
                       budget_bytes=6 << 20, target_rows=256):
    """Largest batch-tile (divisor of B) whose f32 working set fits the budget.
    Stops growing once the matmul M-dim is comfortably large; if that leaves a
    single grid step, split it in two so v7x's two TensorCores both get work."""
    best = 1
    for bt in range(1, B + 1):
        if B % bt:
            continue
        rows = bt * L
        act = 4 * rows * (D + 2 * dim_qk + 2 * dim_v + mlp_dim + 3 * D)
        act += 4 * bt * num_heads * L * L * 2           # scores + probs
        if act > budget_bytes:
            break
        best = bt
        if rows >= 4 * target_rows:
            break
    if B // best == 1 and best % 2 == 0 and (best // 2) * L >= target_rows:
        best //= 2          # expose >=2 parallel steps for v7x megacore
    return best


def transformer_encoder_layer(x, params, *, num_heads, eps=1e-5,
                              batch_tile=None, compute_dtype=jnp.bfloat16):
    B, L, D = x.shape
    wq, bq, wk, bk, wv, bv, w1, b1, w2, b2, gamma, beta = params
    dim_qk = wq.shape[1]
    dim_v = wv.shape[1]
    mlp_dim = w1.shape[1]
    assert dim_v == D, "dim_v must equal dim for the residual / LayerNorm"
    assert dim_qk % num_heads == 0 and dim_v % num_heads == 0

    # Fold the attention scale (full dim_qk, exactly as the PyTorch module does)
    # into the query projection, and the "x = x + x" doubling into the value
    # projection (exact power-of-two scaling), so the kernel never re-touches
    # the score matrix or the attention output.
    scale = 1.0 / math.sqrt(float(dim_qk))
    wq_c = (wq * scale).astype(compute_dtype)
    bq_s = (bq * scale).astype(jnp.float32)
    wk_c = wk.astype(compute_dtype)
    wv_c = (wv * 2.0).astype(compute_dtype)
    bv_s = (bv * 2.0).astype(jnp.float32)
    w1_c = w1.astype(compute_dtype)
    w2_c = w2.astype(compute_dtype)
    x_c = x.astype(compute_dtype)

    bt = batch_tile or _choose_batch_tile(B, L, D, dim_qk, dim_v, mlp_dim,
                                          num_heads)
    assert B % bt == 0, "batch tile must divide batch"
    grid = (B // bt,)

    def full_spec(arr):
        nd = arr.ndim
        return pl.BlockSpec(arr.shape, lambda b, _nd=nd: (0,) * _nd)

    kernel = functools.partial(
        _encoder_layer_kernel,
        bt=bt, num_heads=num_heads, dim_qk=dim_qk, dim_v=dim_v, eps=eps,
        compute_dtype=compute_dtype)

    # VMEM budget: double-buffered bf16 weights + x/out blocks + live f32
    # intermediates.  Only raise the scoped limit when the default (16/32 MiB)
    # is clearly too small; cap at v7x's 64 MiB physical VMEM.
    weight_bytes = 2 * 2 * (D * dim_qk * 2 + D * dim_v + D * mlp_dim + mlp_dim * D)
    io_bytes = 2 * (2 + 4) * bt * L * D
    act_bytes = 4 * bt * L * (D + 2 * dim_qk + 2 * dim_v + mlp_dim + 3 * D)
    act_bytes += 4 * bt * num_heads * L * L * 2
    est = weight_bytes + io_bytes + act_bytes
    cp_kwargs = dict(dimension_semantics=("parallel",))
    if est > (24 << 20):
        cp_kwargs["vmem_limit_bytes"] = int(min(est * 5 // 4, 64 << 20))
    # TODO(synk): for production sizes (large D / mlp_dim) the FFN should be
    # tiled over mlp_dim with an 'arbitrary' K grid axis + VMEM accumulator so
    # the resident weights stay within v7x's 64 MiB VMEM.

    return pl.pallas_call(
        kernel,
        out_shape=jax.ShapeDtypeStruct((B, L, D), jnp.float32),
        grid_spec=pltpu.PrefetchScalarGridSpec(
            num_scalar_prefetch=0,
            grid=grid,
            in_specs=[
                pl.BlockSpec((bt, L, D), lambda b: (b, 0, 0)),   # x
                full_spec(wq_c), full_spec(bq_s),
                full_spec(wk_c), full_spec(bk),
                full_spec(wv_c), full_spec(bv_s),
                full_spec(w1_c), full_spec(b1),
                full_spec(w2_c), full_spec(b2),
                full_spec(gamma), full_spec(beta),
            ],
            out_specs=pl.BlockSpec((bt, L, D), lambda b: (b, 0, 0)),
        ),
        compiler_params=pltpu.CompilerParams(**cp_kwargs),
    )(x_c, wq_c, bq_s, wk_c, bk, wv_c, bv_s, w1_c, b1, w2_c, b2, gamma, beta)


def _reference(x, params, *, num_heads, eps=1e-5, compute_dtype=jnp.float32):
    """Plain-JAX reference mirroring the PyTorch forward pass.

    With compute_dtype=jnp.bfloat16 it applies the same cast points as the
    kernel (bf16 matmul operands, f32 accumulation, f32 softmax/GELU/LN), so it
    is directly comparable to the Pallas output at tight tolerance."""
    wq, bq, wk, bk, wv, bv, w1, b1, w2, b2, gamma, beta = params
    B, L, D = x.shape
    dim_qk = wq.shape[1]
    dim_v = wv.shape[1]
    H = num_heads
    dh_qk = dim_qk // H
    dh_v = dim_v // H
    f32 = jnp.float32
    c = lambda a: a.astype(compute_dtype)
    scale = 1.0 / math.sqrt(float(dim_qk))

    q = jnp.einsum("bld,de->ble", c(x), c(wq * scale),
                   preferred_element_type=f32) + bq[0] * scale
    k = jnp.einsum("bld,de->ble", c(x), c(wk), preferred_element_type=f32) + bk[0]
    v = jnp.einsum("bld,de->ble", c(x), c(wv), preferred_element_type=f32) + bv[0]

    q = q.reshape(B, L, H, dh_qk).transpose(0, 2, 1, 3)
    k = k.reshape(B, L, H, dh_qk).transpose(0, 2, 1, 3)
    v = v.reshape(B, L, H, dh_v).transpose(0, 2, 1, 3)
    s = jnp.einsum("bhqd,bhkd->bhqk", c(q), c(k), preferred_element_type=f32)
    p = jax.nn.softmax(s, axis=-1)
    out = jnp.einsum("bhqk,bhkd->bhqd", c(p), c(v), preferred_element_type=f32)
    out = out.transpose(0, 2, 1, 3).reshape(B, L, dim_v)

    x2 = out + out
    h1 = jnp.einsum("bld,de->ble", c(x2), c(w1), preferred_element_type=f32) + b1[0]
    h1 = 0.5 * h1 * (1.0 + lax.erf(h1 * 0.7071067811865476))
    y = jnp.einsum("ble,ed->bld", c(h1), c(w2), preferred_element_type=f32) + b2[0] + x2
    mean = jnp.mean(y, axis=-1, keepdims=True)
    var = jnp.mean((y - mean) ** 2, axis=-1, keepdims=True)
    return (y - mean) * lax.rsqrt(var + eps) * gamma[0] + beta[0]


if __name__ == "__main__":
    # Small, deterministic problem: B=2, seq L=8, dim D=32, mlp_dim=64, 4 heads.
    B, L, D = 2, 8, 32
    mlp_dim = 64
    num_heads = 4
    dim_qk = D   # module defaults
    dim_v = D

    key = jax.random.PRNGKey(0)
    keys = jax.random.split(key, 14)

    def init(k, shape, scale=0.1):
        return (scale * jax.random.normal(k, shape)).astype(jnp.float32)

    x = init(keys[0], (B, L, D), 1.0)
    wq = init(keys[1], (D, dim_qk));   bq = init(keys[2], (1, dim_qk))
    wk = init(keys[3], (D, dim_qk));   bk = init(keys[4], (1, dim_qk))
    wv = init(keys[5], (D, dim_v));    bv = init(keys[6], (1, dim_v))
    w1 = init(keys[7], (D, mlp_dim));  b1 = init(keys[8], (1, mlp_dim))
    w2 = init(keys[9], (mlp_dim, D));  b2 = init(keys[10], (1, D))
    gamma = jnp.ones((1, D), jnp.float32) + init(keys[11], (1, D), 0.05)
    beta = init(keys[12], (1, D), 0.05)

    params = (wq, bq, wk, bk, wv, bv, w1, b1, w2, b2, gamma, beta)

    out = transformer_encoder_layer(x, params, num_heads=num_heads)
    out = jax.block_until_ready(out)

    # Compare against a reference with the same bf16 matmul cast points
    # (f32 accumulation, f32 softmax/GELU/LayerNorm) as the kernel.
    ref = _reference(x, params, num_heads=num_heads, compute_dtype=jnp.bfloat16)

    assert out.shape == (B, L, D)
    assert bool(jnp.all(jnp.isfinite(out)))
    max_err = float(jnp.max(jnp.abs(out - ref)))
    assert max_err < 1e-2, f"max err {max_err}"

    print("KERNEL_OK")
</pallas_src>

<mosaic_0001>
module attributes {stable_mosaic.version = 11 : i64} {
  func.func @_encoder_layer_kernel(%arg0: i32, %arg1: memref<2x8x32xbf16, #tpu.memory_space<vmem>>, %arg2: memref<32x32xbf16, #tpu.memory_space<vmem>>, %arg3: memref<1x32xf32, #tpu.memory_space<vmem>>, %arg4: memref<32x32xbf16, #tpu.memory_space<vmem>>, %arg5: memref<1x32xf32, #tpu.memory_space<vmem>>, %arg6: memref<32x32xbf16, #tpu.memory_space<vmem>>, %arg7: memref<1x32xf32, #tpu.memory_space<vmem>>, %arg8: memref<32x64xbf16, #tpu.memory_space<vmem>>, %arg9: memref<1x64xf32, #tpu.memory_space<vmem>>, %arg10: memref<64x32xbf16, #tpu.memory_space<vmem>>, %arg11: memref<1x32xf32, #tpu.memory_space<vmem>>, %arg12: memref<1x32xf32, #tpu.memory_space<vmem>>, %arg13: memref<1x32xf32, #tpu.memory_space<vmem>>, %arg14: memref<2x8x32xf32, #tpu.memory_space<vmem>>) attributes {dimension_semantics = [#tpu.dimension_semantics<parallel>], iteration_bounds = array<i64: 1>, scalar_prefetch = 0 : i64, scratch_operands = 0 : i64, tpu.core_type = #tpu.core_type<tc>, window_params = [{transform_indices = @transform_0, window_bounds = array<i64: 2, 8, 32>}, {pipeline_mode = #tpu.pipeline_mode<synchronous>, transform_indices = @transform_1, window_bounds = array<i64: 32, 32>}, {pipeline_mode = #tpu.pipeline_mode<synchronous>, transform_indices = @transform_2, window_bounds = array<i64: 1, 32>}, {pipeline_mode = #tpu.pipeline_mode<synchronous>, transform_indices = @transform_3, window_bounds = array<i64: 32, 32>}, {pipeline_mode = #tpu.pipeline_mode<synchronous>, transform_indices = @transform_4, window_bounds = array<i64: 1, 32>}, {pipeline_mode = #tpu.pipeline_mode<synchronous>, transform_indices = @transform_5, window_bounds = array<i64: 32, 32>}, {pipeline_mode = #tpu.pipeline_mode<synchronous>, transform_indices = @transform_6, window_bounds = array<i64: 1, 32>}, {pipeline_mode = #tpu.pipeline_mode<synchronous>, transform_indices = @transform_7, window_bounds = array<i64: 32, 64>}, {pipeline_mode = #tpu.pipeline_mode<synchronous>, transform_indices = @transform_8, window_bounds = array<i64: 1, 64>}, {pipeline_mode = #tpu.pipeline_mode<synchronous>, transform_indices = @transform_9, window_bounds = array<i64: 64, 32>}, {pipeline_mode = #tpu.pipeline_mode<synchronous>, transform_indices = @transform_10, window_bounds = array<i64: 1, 32>}, {pipeline_mode = #tpu.pipeline_mode<synchronous>, transform_indices = @transform_11, window_bounds = array<i64: 1, 32>}, {pipeline_mode = #tpu.pipeline_mode<synchronous>, transform_indices = @transform_12, window_bounds = array<i64: 1, 32>}, {transform_indices = @transform_13, window_bounds = array<i64: 2, 8, 32>}]} {
    %c0 = arith.constant 0 : index
    %c0_0 = arith.constant 0 : index
    %0 = vector.load %arg3[%c0, %c0_0] : memref<1x32xf32, #tpu.memory_space<vmem>>, vector<1x32xf32>
    %1 = vector.shape_cast %0 : vector<1x32xf32> to vector<32xf32>
    %c0_1 = arith.constant 0 : index
    %c0_2 = arith.constant 0 : index
    %2 = vector.load %arg5[%c0_1, %c0_2] : memref<1x32xf32, #tpu.memory_space<vmem>>, vector<1x32xf32>
    %3 = vector.shape_cast %2 : vector<1x32xf32> to vector<32xf32>
    %c0_3 = arith.constant 0 : index
    %c0_4 = arith.constant 0 : index
    %4 = vector.load %arg7[%c0_3, %c0_4] : memref<1x32xf32, #tpu.memory_space<vmem>>, vector<1x32xf32>
    %5 = vector.shape_cast %4 : vector<1x32xf32> to vector<32xf32>
    %c0_5 = arith.constant 0 : index
    %c0_6 = arith.constant 0 : index
    %6 = vector.load %arg9[%c0_5, %c0_6] : memref<1x64xf32, #tpu.memory_space<vmem>>, vector<1x64xf32>
    %7 = vector.shape_cast %6 : vector<1x64xf32> to vector<64xf32>
    %c0_7 = arith.constant 0 : index
    %c0_8 = arith.constant 0 : index
    %8 = vector.load %arg11[%c0_7, %c0_8] : memref<1x32xf32, #tpu.memory_space<vmem>>, vector<1x32xf32>
    %9 = vector.shape_cast %8 : vector<1x32xf32> to vector<32xf32>
    %c0_9 = arith.constant 0 : index
    %c0_10 = arith.constant 0 : index
    %10 = vector.load %arg12[%c0_9, %c0_10] : memref<1x32xf32, #tpu.memory_space<vmem>>, vector<1x32xf32>
    %11 = vector.shape_cast %10 : vector<1x32xf32> to vector<32xf32>
    %c0_11 = arith.constant 0 : index
    %c0_12 = arith.constant 0 : index
    %12 = vector.load %arg13[%c0_11, %c0_12] : memref<1x32xf32, #tpu.memory_space<vmem>>, vector<1x32xf32>
    %13 = vector.shape_cast %12 : vector<1x32xf32> to vector<32xf32>
    %c0_13 = arith.constant 0 : index
    %c0_14 = arith.constant 0 : index
    %c0_15 = arith.constant 0 : index
    %14 = vector.load %arg1[%c0_13, %c0_14, %c0_15] : memref<2x8x32xbf16, #tpu.memory_space<vmem>>, vector<2x8x32xbf16>
    %15 = vector.shape_cast %14 : vector<2x8x32xbf16> to vector<16x32xbf16>
    %c0_16 = arith.constant 0 : index
    %c0_17 = arith.constant 0 : index
    %16 = vector.load %arg2[%c0_16, %c0_17] : memref<32x32xbf16, #tpu.memory_space<vmem>>, vector<32x32xbf16>
    %cst = arith.constant dense<0.000000e+00> : vector<16x32xf32>
    %17 = tpu.matmul %15, %16, %cst {dimension_numbers = #tpu.dot_dimension_numbers<[1], [0], [0], [1], [0, 0, 1, 1], [], []>} : vector<16x32xbf16>, vector<32x32xbf16>, vector<16x32xf32> -> vector<16x32xf32>
    %18 = vector.shape_cast %1 : vector<32xf32> to vector<1x32xf32>
    %19 = vector.broadcast %18 : vector<1x32xf32> to vector<16x32xf32>
    %20 = arith.addf %17, %19 : vector<16x32xf32>
    %c0_18 = arith.constant 0 : index
    %c0_19 = arith.constant 0 : index
    %21 = vector.load %arg4[%c0_18, %c0_19] : memref<32x32xbf16, #tpu.memory_space<vmem>>, vector<32x32xbf16>
    %cst_20 = arith.constant dense<0.000000e+00> : vector<16x32xf32>
    %22 = tpu.matmul %15, %21, %cst_20 {dimension_numbers = #tpu.dot_dimension_numbers<[1], [0], [0], [1], [0, 0, 1, 1], [], []>} : vector<16x32xbf16>, vector<32x32xbf16>, vector<16x32xf32> -> vector<16x32xf32>
    %23 = vector.shape_cast %3 : vector<32xf32> to vector<1x32xf32>
    %24 = vector.broadcast %23 : vector<1x32xf32> to vector<16x32xf32>
    %25 = arith.addf %22, %24 : vector<16x32xf32>
    %c0_21 = arith.constant 0 : index
    %c0_22 = arith.constant 0 : index
    %26 = vector.load %arg6[%c0_21, %c0_22] : memref<32x32xbf16, #tpu.memory_space<vmem>>, vector<32x32xbf16>
    %cst_23 = arith.constant dense<0.000000e+00> : vector<16x32xf32>
    %27 = tpu.matmul %15, %26, %cst_23 {dimension_numbers = #tpu.dot_dimension_numbers<[1], [0], [0], [1], [0, 0, 1, 1], [], []>} : vector<16x32xbf16>, vector<32x32xbf16>, vector<16x32xf32> -> vector<16x32xf32>
    %28 = vector.shape_cast %5 : vector<32xf32> to vector<1x32xf32>
    %29 = vector.broadcast %28 : vector<1x32xf32> to vector<16x32xf32>
    %30 = arith.addf %27, %29 : vector<16x32xf32>
    %31 = arith.truncf %20 : vector<16x32xf32> to vector<16x32xbf16>
    %32 = vector.shape_cast %31 : vector<16x32xbf16> to vector<2x8x4x8xbf16>
    %33 = tpu.transpose %32, [0, 2, 1, 3] : vector<2x8x4x8xbf16> -> vector<2x4x8x8xbf16>
    %34 = vector.shape_cast %33 : vector<2x4x8x8xbf16> to vector<8x8x8xbf16>
    %35 = arith.truncf %25 : vector<16x32xf32> to vector<16x32xbf16>
    %36 = vector.shape_cast %35 : vector<16x32xbf16> to vector<2x8x4x8xbf16>
    %37 = tpu.transpose %36, [0, 2, 1, 3] : vector<2x8x4x8xbf16> -> vector<2x4x8x8xbf16>
    %38 = vector.shape_cast %37 : vector<2x4x8x8xbf16> to vector<8x8x8xbf16>
    %39 = arith.truncf %30 : vector<16x32xf32> to vector<16x32xbf16>
    %40 = vector.shape_cast %39 : vector<16x32xbf16> to vector<2x8x4x8xbf16>
    %41 = tpu.transpose %40, [0, 2, 1, 3] : vector<2x8x4x8xbf16> -> vector<2x4x8x8xbf16>
    %42 = vector.shape_cast %41 : vector<2x4x8x8xbf16> to vector<8x8x8xbf16>
    "tpu.trace_start"() <{level = 10 : i32, message = "gld,gmd->glm"}> : () -> ()
    %cst_24 = arith.constant dense<0.000000e+00> : vector<8x8x8xf32>
    %43 = tpu.matmul %34, %38, %cst_24 {dimension_numbers = #tpu.dot_dimension_numbers<[2], [2], [1], [1], [0, 0, 0, 1, 1, 1], [0], [0]>} : vector<8x8x8xbf16>, vector<8x8x8xbf16>, vector<8x8x8xf32> -> vector<8x8x8xf32>
    "tpu.trace_stop"() : () -> ()
    %cst_25 = arith.constant dense<0xFF800000> : vector<8x8xf32>
    %44 = vector.multi_reduction <maximumf>, %43, %cst_25 [2] : vector<8x8x8xf32> to vector<8x8xf32>
    %45 = vector.shape_cast %44 : vector<8x8xf32> to vector<8x8x1xf32>
    %46 = vector.broadcast %45 : vector<8x8x1xf32> to vector<8x8x8xf32>
    %47 = arith.subf %43, %46 : vector<8x8x8xf32>
    %48 = math.exp %47 : vector<8x8x8xf32>
    %cst_26 = arith.constant dense<0.000000e+00> : vector<8x8xf32>
    %49 = vector.multi_reduction <add>, %48, %cst_26 [2] : vector<8x8x8xf32> to vector<8x8xf32>
    %50 = vector.shape_cast %49 : vector<8x8xf32> to vector<8x8x1xf32>
    %51 = tpu.reciprocal %50 {approx = true} : vector<8x8x1xf32> -> vector<8x8x1xf32>
    %52 = vector.broadcast %51 : vector<8x8x1xf32> to vector<8x8x8xf32>
    %53 = arith.mulf %48, %52 : vector<8x8x8xf32>
    %54 = arith.truncf %53 : vector<8x8x8xf32> to vector<8x8x8xbf16>
    "tpu.trace_start"() <{level = 10 : i32, message = "glm,gmd->gld"}> : () -> ()
    %cst_27 = arith.constant dense<0.000000e+00> : vector<8x8x8xf32>
    %55 = tpu.matmul %54, %42, %cst_27 {dimension_numbers = #tpu.dot_dimension_numbers<[2], [1], [1], [2], [0, 0, 0, 1, 1, 2], [0], [0]>} : vector<8x8x8xbf16>, vector<8x8x8xbf16>, vector<8x8x8xf32> -> vector<8x8x8xf32>
    "tpu.trace_stop"() : () -> ()
    %56 = vector.shape_cast %55 : vector<8x8x8xf32> to vector<2x4x8x8xf32>
    %57 = tpu.transpose %56, [0, 2, 1, 3] : vector<2x4x8x8xf32> -> vector<2x8x4x8xf32>
    %58 = vector.shape_cast %57 : vector<2x8x4x8xf32> to vector<16x32xf32>
    %59 = arith.truncf %58 : vector<16x32xf32> to vector<16x32xbf16>
    %c0_28 = arith.constant 0 : index
    %c0_29 = arith.constant 0 : index
    %60 = vector.load %arg8[%c0_28, %c0_29] : memref<32x64xbf16, #tpu.memory_space<vmem>>, vector<32x64xbf16>
    %cst_30 = arith.constant dense<0.000000e+00> : vector<16x64xf32>
    %61 = tpu.matmul %59, %60, %cst_30 {dimension_numbers = #tpu.dot_dimension_numbers<[1], [0], [0], [1], [0, 0, 1, 1], [], []>} : vector<16x32xbf16>, vector<32x64xbf16>, vector<16x64xf32> -> vector<16x64xf32>
    %62 = vector.shape_cast %7 : vector<64xf32> to vector<1x64xf32>
    %63 = vector.broadcast %62 : vector<1x64xf32> to vector<16x64xf32>
    %64 = arith.addf %61, %63 : vector<16x64xf32>
    %cst_31 = arith.constant 5.000000e-01 : f32
    %65 = vector.broadcast %cst_31 : f32 to vector<16x64xf32>
    %66 = arith.mulf %65, %64 : vector<16x64xf32>
    %cst_32 = arith.constant 0.707106769 : f32
    %67 = vector.broadcast %cst_32 : f32 to vector<16x64xf32>
    %68 = arith.mulf %64, %67 : vector<16x64xf32>
    %69 = math.erf %68 : vector<16x64xf32>
    %cst_33 = arith.constant 1.000000e+00 : f32
    %70 = vector.broadcast %cst_33 : f32 to vector<16x64xf32>
    %71 = arith.addf %70, %69 : vector<16x64xf32>
    %72 = arith.mulf %66, %71 : vector<16x64xf32>
    %73 = arith.truncf %72 : vector<16x64xf32> to vector<16x64xbf16>
    %c0_34 = arith.constant 0 : index
    %c0_35 = arith.constant 0 : index
    %74 = vector.load %arg10[%c0_34, %c0_35] : memref<64x32xbf16, #tpu.memory_space<vmem>>, vector<64x32xbf16>
    %cst_36 = arith.constant dense<0.000000e+00> : vector<16x32xf32>
    %75 = tpu.matmul %73, %74, %cst_36 {dimension_numbers = #tpu.dot_dimension_numbers<[1], [0], [0], [1], [0, 0, 1, 1], [], []>} : vector<16x64xbf16>, vector<64x32xbf16>, vector<16x32xf32> -> vector<16x32xf32>
    %76 = vector.shape_cast %9 : vector<32xf32> to vector<1x32xf32>
    %77 = vector.broadcast %76 : vector<1x32xf32> to vector<16x32xf32>
    %78 = arith.addf %75, %77 : vector<16x32xf32>
    %79 = arith.addf %78, %58 : vector<16x32xf32>
    %cst_37 = arith.constant dense<0.000000e+00> : vector<16xf32>
    %80 = vector.multi_reduction <add>, %79, %cst_37 [1] : vector<16x32xf32> to vector<16xf32>
    %81 = vector.shape_cast %80 : vector<16xf32> to vector<16x1xf32>
    %cst_38 = arith.constant 3.200000e+01 : f32
    %82 = vector.broadcast %cst_38 : f32 to vector<16x1xf32>
    %83 = arith.divf %81, %82 : vector<16x1xf32>
    %84 = vector.broadcast %83 : vector<16x1xf32> to vector<16x32xf32>
    %85 = arith.subf %79, %84 : vector<16x32xf32>
    %86 = vector.broadcast %83 : vector<16x1xf32> to vector<16x32xf32>
    %87 = arith.subf %79, %86 : vector<16x32xf32>
    %88 = arith.mulf %85, %87 : vector<16x32xf32>
    %cst_39 = arith.constant dense<0.000000e+00> : vector<16xf32>
    %89 = vector.multi_reduction <add>, %88, %cst_39 [1] : vector<16x32xf32> to vector<16xf32>
    %90 = vector.shape_cast %89 : vector<16xf32> to vector<16x1xf32>
    %cst_40 = arith.constant 3.200000e+01 : f32
    %91 = vector.broadcast %cst_40 : f32 to vector<16x1xf32>
    %92 = arith.divf %90, %91 : vector<16x1xf32>
    %93 = vector.broadcast %83 : vector<16x1xf32> to vector<16x32xf32>
    %94 = arith.subf %79, %93 : vector<16x32xf32>
    %cst_41 = arith.constant 9.99999974E-6 : f32
    %95 = vector.broadcast %cst_41 : f32 to vector<16x1xf32>
    %96 = arith.addf %92, %95 : vector<16x1xf32>
    %97 = math.rsqrt %96 : vector<16x1xf32>
    %98 = vector.broadcast %97 : vector<16x1xf32> to vector<16x32xf32>
    %99 = arith.mulf %94, %98 : vector<16x32xf32>
    %100 = vector.shape_cast %11 : vector<32xf32> to vector<1x32xf32>
    %101 = vector.broadcast %100 : vector<1x32xf32> to vector<16x32xf32>
    %102 = arith.mulf %99, %101 : vector<16x32xf32>
    %103 = vector.shape_cast %13 : vector<32xf32> to vector<1x32xf32>
    %104 = vector.broadcast %103 : vector<1x32xf32> to vector<16x32xf32>
    %105 = arith.addf %102, %104 : vector<16x32xf32>
    %106 = vector.shape_cast %105 : vector<16x32xf32> to vector<2x8x32xf32>
    %c0_42 = arith.constant 0 : index
    %c0_43 = arith.constant 0 : index
    %c0_44 = arith.constant 0 : index
    %107 = vector.load %arg14[%c0_42, %c0_43, %c0_44] : memref<2x8x32xf32, #tpu.memory_space<vmem>>, vector<2x8x32xf32>
    tpu.vector_store %arg14[%c0_42, %c0_43, %c0_44], %106 {strides = array<i32>} : memref<2x8x32xf32, #tpu.memory_space<vmem>>, vector<2x8x32xf32>,
    return
  }
  func.func @transform_0(%arg0: i32) -> (i32, i32, i32) {
    %c0_i32 = arith.constant 0 : i32
    %c0_i32_0 = arith.constant 0 : i32
    %c0_i32_1 = arith.constant 0 : i32
    return %arg0, %c0_i32, %c0_i32_0 : i32, i32, i32
  }
  func.func @transform_1(%arg0: i32) -> (i32, i32) {
    %c0_i32 = arith.constant 0 : i32
    %c0_i32_0 = arith.constant 0 : i32
    %c0_i32_1 = arith.constant 0 : i32
    return %c0_i32, %c0_i32_0 : i32, i32
  }
  func.func @transform_2(%arg0: i32) -> (i32, i32) {
    %c0_i32 = arith.constant 0 : i32
    %c0_i32_0 = arith.constant 0 : i32
    %c0_i32_1 = arith.constant 0 : i32
    return %c0_i32, %c0_i32_0 : i32, i32
  }
  func.func @transform_3(%arg0: i32) -> (i32, i32) {
    %c0_i32 = arith.constant 0 : i32
    %c0_i32_0 = arith.constant 0 : i32
    %c0_i32_1 = arith.constant 0 : i32
    return %c0_i32, %c0_i32_0 : i32, i32
  }
  func.func @transform_4(%arg0: i32) -> (i32, i32) {
    %c0_i32 = arith.constant 0 : i32
    %c0_i32_0 = arith.constant 0 : i32
    %c0_i32_1 = arith.constant 0 : i32
    return %c0_i32, %c0_i32_0 : i32, i32
  }
  func.func @transform_5(%arg0: i32) -> (i32, i32) {
    %c0_i32 = arith.constant 0 : i32
    %c0_i32_0 = arith.constant 0 : i32
    %c0_i32_1 = arith.constant 0 : i32
    return %c0_i32, %c0_i32_0 : i32, i32
  }
  func.func @transform_6(%arg0: i32) -> (i32, i32) {
    %c0_i32 = arith.constant 0 : i32
    %c0_i32_0 = arith.constant 0 : i32
    %c0_i32_1 = arith.constant 0 : i32
    return %c0_i32, %c0_i32_0 : i32, i32
  }
  func.func @transform_7(%arg0: i32) -> (i32, i32) {
    %c0_i32 = arith.constant 0 : i32
    %c0_i32_0 = arith.constant 0 : i32
    %c0_i32_1 = arith.constant 0 : i32
    return %c0_i32, %c0_i32_0 : i32, i32
  }
  func.func @transform_8(%arg0: i32) -> (i32, i32) {
    %c0_i32 = arith.constant 0 : i32
    %c0_i32_0 = arith.constant 0 : i32
    %c0_i32_1 = arith.constant 0 : i32
    return %c0_i32, %c0_i32_0 : i32, i32
  }
  func.func @transform_9(%arg0: i32) -> (i32, i32) {
    %c0_i32 = arith.constant 0 : i32
    %c0_i32_0 = arith.constant 0 : i32
    %c0_i32_1 = arith.constant 0 : i32
    return %c0_i32, %c0_i32_0 : i32, i32
  }
  func.func @transform_10(%arg0: i32) -> (i32, i32) {
    %c0_i32 = arith.constant 0 : i32
    %c0_i32_0 = arith.constant 0 : i32
    %c0_i32_1 = arith.constant 0 : i32
    return %c0_i32, %c0_i32_0 : i32, i32
  }
  func.func @transform_11(%arg0: i32) -> (i32, i32) {
    %c0_i32 = arith.constant 0 : i32
    %c0_i32_0 = arith.constant 0 : i32
    %c0_i32_1 = arith.constant 0 : i32
    return %c0_i32, %c0_i32_0 : i32, i32
  }
  func.func @transform_12(%arg0: i32) -> (i32, i32) {
    %c0_i32 = arith.constant 0 : i32
    %c0_i32_0 = arith.constant 0 : i32
    %c0_i32_1 = arith.constant 0 : i32
    return %c0_i32, %c0_i32_0 : i32, i32
  }
  func.func @transform_13(%arg0: i32) -> (i32, i32, i32) {
    %c0_i32 = arith.constant 0 : i32
    %c0_i32_0 = arith.constant 0 : i32
    %c0_i32_1 = arith.constant 0 : i32
    return %arg0, %c0_i32, %c0_i32_0 : i32, i32, i32
  }
}

</mosaic_0001>

<bundles_post_ra>
// kernel: tpu_custom_call.1
= control target key start
LH: loop header
LB: loop body
LE: loop exit
PB: predicated region body
PF: predicated region fallthrough
CT: control target
= control target key end

     0   :  { %18 = vsyncpa [#allocation3], 0  ;;  %s3522_s0 = inlined_call_operand.hbm [shape: bf16[2,8,32], index: 0, kind: input, shape index: {}]   ;;  %s3523_s1 = inlined_call_operand.vmem [shape: bf16[32,32], index: 1, kind: input, shape index: {}]   ;;  %s3524_s2 = inlined_call_operand.hbm [shape: f32[1,32], index: 2, kind: input, shape index: {}]   ;;  %s3525_s3 = inlined_call_operand.vmem [shape: bf16[32,32], index: 3, kind: input, shape index: {}]   ;;  %s3526_s4 = inlined_call_operand.hbm [shape: f32[1,32], index: 4, kind: input, shape index: {}]   ;;  %s3527_s5 = inlined_call_operand.vmem [shape: bf16[32,32], index: 5, kind: input, shape index: {}]   ;;  %s3528_s6 = inlined_call_operand.hbm [shape: f32[1,32], index: 6, kind: input, shape index: {}]   ;;  %s3529_s7 = inlined_call_operand.hbm [shape: bf16[32,64], index: 7, kind: input, shape index: {}]   ;;  %s3530_s8 = inlined_call_operand.hbm [shape: f32[1,64], index: 8, kind: input, shape index: {}]   ;;  %s3531_s9 = inlined_call_operand.vmem [shape: bf16[64,32], index: 9, kind: input, shape index: {}]   ;;  %s3532_s10 = inlined_call_operand.vmem [shape: f32[1,32], index: 10, kind: input, shape index: {}]   ;;  %s3533_s11 = inlined_call_operand.vmem [shape: f32[1,32], index: 11, kind: input, shape index: {}]   ;;  %s3534_s12 = inlined_call_operand.vmem [shape: f32[1,32], index: 12, kind: input, shape index: {}]   ;;  %s3535_s13 = inlined_call_operand.hbm [shape: f32[2,8,32], index: 13, kind: output, shape index: {}]  }
   0x1   :  { %19 = vsyncpa [#allocation6], 0 }
   0x2   :  { %20 = vsyncpa [#allocation9], 0 }
   0x3   :  { %21 = vsyncpa [#allocation12], 0 }
   0x4   :  { %22 = vsyncpa [#allocation4], 0  ;;  %s3009_s25 = smov [#allocation5]   ;;  %s3010_s27 = smov [#allocation8]  }
   0x5   :  { %s43_s26 = sshll.u32 %s3009_s25, 4  ;;  %s67_s28 = sshll.u32 %s3010_s27, 4  ;;  %s44_s26 = int_to_ptr.vmem [resolvable:$true] %s43_s26  ;;  %s68_s28 = int_to_ptr.vmem [resolvable:$true] %s67_s28 }
   0x6   :  { %s2867_s29 = scalar_lea.vmem %s44_s26, 16  ;;  %s2871_s30 = scalar_lea.vmem %s44_s26, 32 }
   0x7   :  { %p2868_p0 = scmp.ne.s32.totalorder %s44_s26, %s2867_s29  ;;  %p2872_p1 = scmp.lt.s32.totalorder %s44_s26, %s44_s26 }
   0x8   :  { %p2873_p2 = scmp.lt.s32.totalorder %s2871_s30, %s2867_s29 }
   0xa   :  { %p2874_p3 = por %p2873_p2, %p2872_p1 }
   0xc   :  { %p2875_p4 = pnand %p2874_p3, %p2868_p0 }
   0xe   :  { %2878 = shalt.err (!%p2875_p4)
}
   0xf   :  { %46 = dma.hbm_to_vmem [thread:$0]  %s3524_s2, 16, %s44_s26, [#allocation6]  }
  0x10   :  { %s2887_s16 = scalar_lea.vmem %s68_s28, 16  ;;  %s2891_s17 = scalar_lea.vmem %s68_s28, 32 }
  0x11   :  { %p2888_p5 = scmp.ne.s32.totalorder %s68_s28, %s2887_s16  ;;  %p2892_p6 = scmp.lt.s32.totalorder %s68_s28, %s68_s28 }
  0x12   :  { %p2893_p7 = scmp.lt.s32.totalorder %s2891_s17, %s2887_s16 }
  0x14   :  { %p2894_p8 = por %p2893_p7, %p2892_p6 }
  0x16   :  { %p2895_p9 = pnand %p2894_p8, %p2888_p5 }
  0x18   :  { %2898 = shalt.err (!%p2895_p9)
}
  0x19   :  { %70 = dma.hbm_to_vmem [thread:$0]  %s3528_s6, 16, %s68_s28, [#allocation9]  }
  0x1a   :  { %s3011_s20 = smov [#allocation2]  }
  0x1b   :  { %s28_s21 = sshll.u32 %s3011_s20, 4  ;;  %s29_s21 = int_to_ptr.vmem [resolvable:$true] %s28_s21 }
  0x1c   :  { %s2907_s22 = scalar_lea.vmem %s29_s21, 128  ;;  %p2912_p11 = scmp.lt.s32.totalorder %s29_s21, %s29_s21 }
  0x1d   :  { %p2908_p10 = scmp.ne.s32.totalorder %s29_s21, %s2907_s22  ;;  %p2913_p12 = scmp.lt.s32.totalorder %s2907_s22, %s2907_s22 }
  0x1f   :  { %p2914_p13 = por %p2913_p12, %p2912_p11 }
  0x21   :  { %p2915_p0 = pnand %p2914_p13, %p2908_p10 }
  0x23   :  { %2918 = shalt.err (!%p2915_p0)
}
  0x24   :  { %s3012_s2 = smov 64   ;;  %s3013_s23 = smov 4  }
  0x25   :  { %34 = dma.hbm_to_vmem [thread:$0]  %s3522_s0, 128, %s29_s21, [#allocation3], %s3012_s2, %s3012_s2, %s3013_s23  }
  0x26   :  { %s3014_s26 = smov [#allocation7]   ;;  %s3015_s6 = smov [#allocation10]  }
  0x27   :  { %s55_s27 = sshll.u32 %s3014_s26, 4  ;;  %s76_s28 = sshll.u32 %s3015_s6, 4  ;;  %s56_s27 = int_to_ptr.vmem [resolvable:$true] %s55_s27  ;;  %s77_s28 = int_to_ptr.vmem [resolvable:$true] %s76_s28 }
  0x28   :  { %s2927_s29 = scalar_lea.vmem %s56_s27, 16  ;;  %s2931_s30 = scalar_lea.vmem %s56_s27, 32 }
  0x29   :  { %p2928_p1 = scmp.ne.s32.totalorder %s56_s27, %s2927_s29  ;;  %p2932_p2 = scmp.lt.s32.totalorder %s56_s27, %s56_s27 }
  0x2a   :  { %p2933_p3 = scmp.lt.s32.totalorder %s2931_s30, %s2927_s29 }
  0x2c   :  { %p2934_p4 = por %p2933_p3, %p2932_p2 }
  0x2e   :  { %p2935_p5 = pnand %p2934_p4, %p2928_p1 }
  0x30   :  { %2938 = shalt.err (!%p2935_p5)
}
  0x31   :  { %58 = dma.hbm_to_vmem [thread:$0]  %s3526_s4, 16, %s56_s27, [#allocation6]  }
  0x32   :  { %s2947_s16 = scalar_lea.vmem %s77_s28, 256  ;;  %p2952_p7 = scmp.lt.s32.totalorder %s77_s28, %s77_s28 }
  0x33   :  { %p2948_p6 = scmp.ne.s32.totalorder %s77_s28, %s2947_s16  ;;  %p2953_p8 = scmp.lt.s32.totalorder %s2947_s16, %s2947_s16 }
  0x35   :  { %p2954_p9 = por %p2953_p8, %p2952_p7 }
  0x37   :  { %p2955_p10 = pnand %p2954_p9, %p2948_p6 }
  0x39   :  { %2958 = shalt.err (!%p2955_p10)
}
  0x3a   :  { %82 = dma.hbm_to_vmem [thread:$0]  %s3529_s7, 256, %s77_s28, [#allocation9], %s3012_s2, %s3012_s2, %s3013_s23  }
  0x3b   :  { %s3016_s18 = smov [#allocation11]  }
  0x3c   :  { %s89_s19 = sshll.u32 %s3016_s18, 4  ;;  %s90_s19 = int_to_ptr.vmem [resolvable:$true] %s89_s19 }
  0x3d   :  { %s2967_s20 = scalar_lea.vmem %s90_s19, 16  ;;  %s2971_s21 = scalar_lea.vmem %s90_s19, 32 }
  0x3e   :  { %p2968_p11 = scmp.ne.s32.totalorder %s90_s19, %s2967_s20  ;;  %p2972_p12 = scmp.lt.s32.totalorder %s90_s19, %s90_s19 }
  0x3f   :  { %p2973_p13 = scmp.lt.s32.totalorder %s2971_s21, %s2967_s20 }
  0x41   :  { %p2974_p0 = por %p2973_p13, %p2972_p12 }
  0x43   :  { %p2975_p1 = pnand %p2974_p0, %p2968_p11 }
  0x45   :  { %2978 = shalt.err (!%p2975_p1)
}
  0x46   :  { %92 = dma.hbm_to_vmem [thread:$0]  %s3530_s8, 16, %s90_s19, [#allocation12]  }
  0x47   :  { %2999 = dma.done.wait [#allocation3], 128  }
  0x48   :  { %3000 = vsyncadd [#allocation3], 4294967168 }
  0x49   :  { %3001 = dma.done.wait [#allocation6], 32  }
  0x4a   :  { %3002 = vsyncadd [#allocation6], 4294967264 }
  0x4b   :  { %3003 = dma.done.wait [#allocation9], 272  }
  0x4c   :  { %3004 = vsyncadd [#allocation9], 4294967024 }
  0x4d   :  { %3005 = dma.done.wait [#allocation12], 16  }
  0x4e   :  { %3006 = vsyncadd [#allocation12], 4294967280  ;;  %v3017_v0 = vmov 0.0   ;;  %vm3018_vm0 = vmmov 0   ;;  %v2806_v1 = vld [vmem:[%s3523_s1 + $0x8] sm:$0xff]   ;;  %v2807_v2 = vld [vmem:[%s3523_s1] sm:$0xff]   ;;  %v361_v26 = vlaneseq }
  0x4f   :  { %2645 = vmatprep.subr.bf16.mxu1 %v3017_v0  ;;  %2649 = vmatprep.mubr.msk.bf16.mxu1 %vm3018_vm0, %v3017_v0  ;;  %v2808_v3 = vld [vmem:[#allocation2] sm:$0xff]   ;;  %vm156_vm1 = vcmask 261120   ;;  %v2809_v4 = vld [vmem:[%s3525_s3 + $0x8] sm:$0xff]   ;;  %s3019_s1 = smov 104   ;;  %s3021_s6 = smov 112   ;;  %v3024_v35 = vmov 0  }
  0x50   :  { %2661 = vmatprep.subr.bf16.mxu0 %v3017_v0  ;;  %2665 = vmatprep.mubr.msk.bf16.mxu0 %vm3018_vm0, %v3017_v0  ;;  %v2810_v5 = vld [vmem:[%s3525_s3] sm:$0xff]   ;;  %v2544_v11 = vld [vmem:[#allocation7] ss:$0 sm:$0xff]  ;;  %v2539_v16 = vld [vmem:[#allocation5] ss:$0 sm:$0xff]  ;;  %s3020_s3 = smov 120   ;;  %v3170_v36 = vpack.i.b16 %v3024_v35, %v3024_v35 }
  0x51   :  { %2646 = vmatpush3.bf16.msra.mxu1 %v2806_v1  ;;  %v2811_v22 = vld [vmem:[%s3527_s5 + $0x8] sm:$0xff]   ;;  %v2812_v23 = vld [vmem:[%s3527_s5] sm:$0xff]   ;;  %v3022_v24 = vmov 1983009808   ;;  %v3023_v27 = vmov 1934713408  }
  0x52   :  { %2647 = vmatprep.subr.bf16.mxu1 %v3017_v0  ;;  %2662 = vmatpush3.bf16.msra.mxu0 %v2811_v22  ;;  %v359_v25 = vunpack.c.l.s4 %v3022_v24  ;;  %v390_v28 = vunpack.c.l.s4 %v3023_v27  ;;  %v362_v30 = vshrl.u32 %v361_v26, 7  ;;  %vm1173_vm2 = vcmask 64512   ;;  %s3025_s5 = smov 16   ;;  %s3026_s15 = smov 8  }
  0x53   :  { %2663 = vmatprep.subr.bf16.mxu0 %v3017_v0  ;;  %vm1641_vm3 = vcmask 1043456   ;;  %s3027_s16 = smov 24   ;;  %vm2305_vm4 = vcmask 130048   ;;  %vm2308_vm5 = vcmask 195584   ;;  %vm2427_vm6 = vcmask 523264   ;;  %s3028_s24 = smov [#allocation13]  }
  0x54   :  { %v360_v29 = vunpack.c.0.s8 %v359_v25  ;;  %v391_v34 = vunpack.c.0.s8 %v390_v28  ;;  %s2524_s25 = sshll.u32 %s3028_s24, 4  ;;  %s2525_s25 = int_to_ptr.vmem [resolvable:$true] %s2524_s25 }
  0x55   :  { %2648 = vmatpush3.bf16.msra.mxu1 %v2807_v2  ;;  %s2979_s26 = scalar_lea.vmem %s2525_s25, 256  ;;  %p2984_p3 = scmp.lt.s32.totalorder %s2525_s25, %s2525_s25 }
  0x56   :  { %2653 = vmatprep.subr.bf16.mxu1 %v3017_v0  ;;  %2664 = vmatpush3.bf16.msra.mxu0 %v2812_v23  ;;  %v3172_v37 = vsub.s32 %v360_v29, %v362_v30  ;;  %v3174_v44 = vsub.s32 %v391_v34, %v362_v30  ;;  %p2980_p2 = scmp.ne.s32.totalorder %s2525_s25, %s2979_s26  ;;  %p2985_p4 = scmp.lt.s32.totalorder %s2979_s26, %s2979_s26 }
  0x57   :  { %2675 = vmatprep.subr.bf16.mxu0 %v3017_v0 }
  0x58   :  { %2650 = vmatmul.mubr.msk.bf16.vlgmr.msra.gmra.mxu1 %vm156_vm1, %v2808_v3  ;;  %p2986_p5 = por %p2985_p4, %p2984_p3 }
  0x59   :  { %2654 = vmatpush3.bf16.msra.mxu1 %v2809_v4  ;;  %2657 = vmatprep.mubr.msk.bf16.mxu1 %vm3018_vm0, %v3017_v0 }
  0x5a   :  { %2655 = vmatprep.subr.bf16.mxu1 %v3017_v0  ;;  %2666 = vmatmul.mubr.msk.bf16.vlgmr.msra.gmra.mxu0 %vm156_vm1, %v2808_v3  ;;  %p2987_p6 = pnand %p2986_p5, %p2980_p2 }
  0x5b   :  { %2677 = vmatprep.mubr.msk.bf16.mxu0 %vm3018_vm0, %v3017_v0 }
  0x5d   :  { %2656 = vmatpush3.bf16.msra.mxu1 %v2810_v5 }
  0x5e   :  { %2669 = vmatprep.subr.bf16.mxu1 %v3017_v0 }
  0x60   :  { %2658 = vmatmul.mubr.msk.bf16.vlgmr.msra.gmra.mxu1 %vm156_vm1, %v2808_v3 }
  0x61   :  { %2671 = vmatprep.mubr.msk.bf16.mxu1 %vm3018_vm0, %v3017_v0 }
 0x118   :  { %v194_v6 = vpop.f32.mrf.mxu1 }
 0x119   :  { %v195_v20 = vadd.f32 %v2539_v16, %v194_v6 }
 0x11a   :  { %v2651_v7 = vpop.f32.mrf.mxu1 }
 0x11c   :  { %v197_v8 = vpop.f32.mrf.mxu1 }
 0x11d   :  { %v198_v18 = vadd.f32 %v2539_v16, %v197_v8 }
 0x11e   :  { %v2652_v9 = vpop.f32.mrf.mxu1 }
 0x11f   :  { %v3148_v21 = vpack.c.bf16 %v198_v18, %v195_v20 }
 0x120   :  { %v257_v10 = vpop.f32.mrf.mxu1 }
 0x121   :  { %v258_v14 = vadd.f32 %v2544_v11, %v257_v10  ;;  %v339_v7 = vshrl.u32 %v3148_v21, 16 }
 0x122   :  { %v2659_v12 = vpop.f32.mrf.mxu1 }
 0x124   :  { %v260_v13 = vpop.f32.mrf.mxu1 }
 0x125   :  { %v261_v15 = vadd.f32 %v2544_v11, %v260_v13 }
 0x126   :  { %v2660_v17 = vpop.f32.mrf.mxu1 }
 0x127   :  { %v613_v19 = vpack.c.bf16 %v261_v15, %v258_v14 }
 0x129   :  { %619 = vrot.lane.b32.xlu1 %v613_v19, %s3019_s1  ;;  %615 = vrot.lane.b32.xlu0 %v613_v19, %s3020_s3  ;;  %v625_v39 = vshrl.u32 %v613_v19, 16 }
 0x12d   :  { %617 = vrot.lane.b32.xlu0 %v613_v19, %s3021_s6  ;;  %329 = vrot.lane.b32.xlu1 %v3148_v21, %s3020_s3 }
 0x131   :  { %331 = vrot.lane.b32.xlu0 %v3148_v21, %s3021_s6  ;;  %333 = vrot.lane.b32.xlu1 %v3148_v21, %s3019_s1 }
 0x19b   :  { %v616_v31 = vpop.permute.xlu0 %615  ;;  %v620_v33 = vpop.permute.xlu1 %619 }
 0x19c   :  { %v626_v32 = vshrl.u32 %v616_v31, 16  ;;  %v623_v38 = vpack.i.b16 %v616_v31, %v613_v19  ;;  %v634_v43 = vshrl.u32 %v620_v33, 16 }
 0x19e   :  { %v627_v41 = vpack.i.b16 %v626_v32, %v625_v39  ;;  %v637_v46 = vcombine.high %v623_v38, %v3170_v36  ;;  %v644_v47 = vrot.slane %v623_v38, %v3172_v37 }
 0x19f   :  { %v618_v40 = vpop.permute.xlu0 %617  ;;  %v330_v51 = vpop.permute.xlu1 %329 }
 0x1a0   :  { %v631_v42 = vpack.i.b16 %v620_v33, %v618_v40  ;;  %v633_v45 = vshrl.u32 %v618_v40, 16  ;;  %v703_v52 = vcombine.high %v627_v41, %v3170_v36  ;;  %v710_v55 = vrot.slane %v627_v41, %v3172_v37 }
 0x1a1   :  { %v651_v59 = vrot.slane %v637_v46, %v3172_v37  ;;  %v340_v62 = vshrl.u32 %v330_v51, 16  ;;  %v337_v3 = vpack.i.b16 %v330_v51, %v3148_v21 }
 0x1a2   :  { %v652_v48 = vcombine.high %v631_v42, %v3170_v36  ;;  %v659_v49 = vrot.slane %v631_v42, %v3172_v37  ;;  %v635_v50 = vpack.i.b16 %v634_v43, %v633_v45  ;;  %v717_v4 = vrot.slane %v703_v52, %v3172_v37 }
 0x1a3   :  { %v332_v12 = vpop.permute.xlu0 %331  ;;  %v334_v13 = vpop.permute.xlu1 %333  ;;  %v341_v16 = vpack.i.b16 %v340_v62, %v339_v7  ;;  %v357_v20 = vcombine.high %v337_v3, %v3170_v36  ;;  %v364_v22 = vrot.slane %v337_v3, %v3172_v37 }
 0x1a4   :  { %v667_v53 = vcombine.low %v644_v47, %v659_v49  ;;  %v668_v54 = vcombine.high %v644_v47, %v659_v49  ;;  %v666_v56 = vrot.slane %v652_v48, %v3172_v37  ;;  %v718_v57 = vcombine.high %v635_v50, %v3170_v36 }
 0x1a5   :  { %v725_v58 = vrot.slane %v635_v50, %v3172_v37  ;;  %v347_v23 = vshrl.u32 %v332_v12, 16  ;;  %v345_v24 = vpack.i.b16 %v334_v13, %v332_v12  ;;  %v348_v29 = vshrl.u32 %v334_v13, 16 }
 0x1a6   :  { %v675_v60 = vrot.slane %v667_v53, %v3174_v44  ;;  %v682_v61 = vrot.slane %v668_v54, %v3174_v44  ;;  %v732_v63 = vrot.slane %v718_v57, %v3172_v37  ;;  %v683_v8 = vcombine.low %v651_v59, %v666_v56 }
 0x1a7   :  { %v733_v1 = vcombine.low %v710_v55, %v725_v58  ;;  %v734_v2 = vcombine.high %v710_v55, %v725_v58  ;;  %v684_v9 = vcombine.high %v651_v59, %v666_v56  ;;  %v372_v30 = vcombine.high %v345_v24, %v3170_v36 }
 0x1a8   :  { %v769_v5 = vcombine.low %v675_v60, %v682_v61  ;;  %v2556_v6 = vcombine.high %v675_v60, %v682_v61  ;;  %v749_v17 = vcombine.low %v717_v4, %v732_v63  ;;  %v750_v21 = vcombine.high %v717_v4, %v732_v63 }
 0x1a9   :  { %v741_v10 = vrot.slane %v733_v1, %v3174_v44  ;;  %v748_v11 = vrot.slane %v734_v2, %v3174_v44  ;;  %v691_v25 = vrot.slane %v683_v8, %v3174_v44  ;;  %v698_v26 = vrot.slane %v684_v9, %v3174_v44 }
 0x1aa   :  { %v776_v14 = vrot.slane %v769_v5, %v3172_v37  ;;  %v784_v15 = vrot.slane %v2556_v6, %v3172_v37  ;;  %v379_v31 = vrot.slane %v345_v24, %v3172_v37  ;;  %v757_v33 = vrot.slane %v749_v17, %v3174_v44 }
 0x1ab   :  { %v794_v18 = vcombine.low %v741_v10, %v748_v11  ;;  %v2557_v19 = vcombine.high %v741_v10, %v748_v11  ;;  %v371_v34 = vrot.slane %v357_v20, %v3172_v37  ;;  %v423_v38 = vcombine.high %v341_v16, %v3170_v36 }
 0x1ac   :  { %v785_v32 = vcombine.low %v776_v14, %v784_v15  ;;  %v764_v40 = vrot.slane %v750_v21, %v3174_v44  ;;  %v349_v41 = vpack.i.b16 %v348_v29, %v347_v23  ;;  %v387_v42 = vcombine.low %v364_v22, %v379_v31 }
 0x1ad   :  { %v801_v27 = vrot.slane %v794_v18, %v3172_v37  ;;  %v809_v28 = vrot.slane %v2557_v19, %v3172_v37  ;;  %v388_v43 = vcombine.high %v364_v22, %v379_v31  ;;  %v819_v45 = vcombine.low %v691_v25, %v698_v26 }
 0x1ae   :  { %v430_v46 = vrot.slane %v341_v16, %v3172_v37  ;;  %v792_v47 = vrot.slane %v785_v32, %v3174_v44  ;;  %v2558_v49 = vcombine.high %v691_v25, %v698_v26  ;;  %v386_v50 = vrot.slane %v372_v30, %v3172_v37 }
 0x1af   :  { %v810_v39 = vcombine.low %v801_v27, %v809_v28  ;;  %v395_v51 = vrot.slane %v387_v42, %v3174_v44  ;;  %v402_v52 = vrot.slane %v388_v43, %v3174_v44  ;;  %v437_v53 = vrot.slane %v423_v38, %v3172_v37 }
 0x1b0   :  { %v438_v54 = vcombine.high %v349_v41, %v3170_v36  ;;  %v445_v55 = vrot.slane %v349_v41, %v3172_v37  ;;  %v844_v57 = vcombine.low %v757_v33, %v764_v40  ;;  %v2559_v58 = vcombine.high %v757_v33, %v764_v40 }
 0x1b1   :  { %v817_v48 = vrot.slane %v810_v39, %v3174_v44  ;;  %v489_v59 = vcombine.low %v395_v51, %v402_v52  ;;  %v2552_v60 = vcombine.high %v395_v51, %v402_v52  ;;  %v826_v2 = vrot.slane %v819_v45, %v3172_v37 }
 0x1b2   :  { %v452_v61 = vrot.slane %v438_v54, %v3172_v37  ;;  %v453_v62 = vcombine.low %v430_v46, %v445_v55  ;;  %v454_v63 = vcombine.high %v430_v46, %v445_v55  ;;  %v403_v3 = vcombine.low %v371_v34, %v386_v50 }
 0x1b3   :  { %v871_v56 = vpack.i.b16 %v817_v48, %v792_v47  ;;  %v496_v4 = vrot.slane %v489_v59, %v3172_v37  ;;  %v504_v5 = vrot.slane %v2552_v60, %v3172_v37  ;;  %v404_v10 = vcombine.high %v371_v34, %v386_v50 }
 0x1b4   :  { %v461_v6 = vrot.slane %v453_v62, %v3174_v44  ;;  %v468_v7 = vrot.slane %v454_v63, %v3174_v44  ;;  %v469_v8 = vcombine.low %v437_v53, %v452_v61  ;;  %v470_v9 = vcombine.high %v437_v53, %v452_v61 }
 0x1b5   :  { %v1178_v1 = vsel %vm1173_vm2, %v871_v56, 0  ;;  %v505_v11 = vcombine.low %v496_v4, %v504_v5  ;;  %v872_v12 = vshrl.u32 %v792_v47, 16  ;;  %v873_v13 = vshrl.u32 %v817_v48, 16 }
 0x1b6   :  { %2670 = vmatpush3.bf16.xpose.msra.mxu1 %v1178_v1  ;;  %v514_v14 = vcombine.low %v461_v6, %v468_v7  ;;  %v2553_v15 = vcombine.high %v461_v6, %v468_v7  ;;  %v851_v16 = vrot.slane %v844_v57, %v3172_v37  ;;  %v859_v17 = vrot.slane %v2559_v58, %v3172_v37 }
 0x1b7   :  { %2681 = vmatprep.subr.bf16.mxu1 %v3017_v0  ;;  %v834_v18 = vrot.slane %v2558_v49, %v3172_v37  ;;  %v477_v19 = vrot.slane %v469_v8, %v3174_v44  ;;  %v484_v20 = vrot.slane %v470_v9, %v3174_v44  ;;  %v874_v21 = vpack.i.b16 %v873_v13, %v872_v12 }
 0x1b8   :  { %v411_v22 = vrot.slane %v403_v3, %v3174_v44  ;;  %v521_v23 = vrot.slane %v514_v14, %v3172_v37  ;;  %v529_v24 = vrot.slane %v2553_v15, %v3172_v37  ;;  %v793_v25 = vcombine.high %v792_v47, %v3024_v35 }
 0x1b9   :  { %v418_v26 = vrot.slane %v404_v10, %v3174_v44  ;;  %v512_v27 = vrot.slane %v505_v11, %v3174_v44  ;;  %v1224_v28 = vsel %vm1173_vm2, %v874_v21, 0  ;;  %v818_v29 = vcombine.high %v817_v48, %v3024_v35 }
 0x1ba   :  { %v530_v30 = vcombine.low %v521_v23, %v529_v24  ;;  %2676 = vmatpush3.bf16.xpose.msra.mxu0 %v1224_v28  ;;  %v860_v31 = vcombine.low %v851_v16, %v859_v17  ;;  %v564_v32 = vcombine.low %v477_v19, %v484_v20  ;;  %v835_v34 = vcombine.low %v826_v2, %v834_v18 }
 0x1bb   :  { %2687 = vmatprep.subr.bf16.mxu0 %v3017_v0  ;;  %v879_v33 = vshrl.u32 %v818_v29, 16  ;;  %v2555_v38 = vcombine.high %v477_v19, %v484_v20  ;;  %v877_v40 = vpack.i.b16 %v818_v29, %v793_v25  ;;  %v878_v41 = vshrl.u32 %v793_v25, 16  ;;  %v2548_v29 = vld [vmem:[#allocation8] ss:$0 sm:$0xff] }
 0x1bc   :  { %v537_v39 = vrot.slane %v530_v30, %v3174_v44  ;;  %v539_v42 = vcombine.low %v411_v22, %v418_v26  ;;  %v2554_v43 = vcombine.high %v411_v22, %v418_v26  ;;  %v592_v45 = vshrl.u32 %v512_v27, 16  ;;  %v320_v30 = vpop.f32.mrf.mxu0 }
 0x1bd   :  { %v880_v49 = vpack.i.b16 %v879_v33, %v878_v41  ;;  %v867_v48 = vrot.slane %v860_v31, %v3174_v44  ;;  %v571_v50 = vrot.slane %v564_v32, %v3172_v37  ;;  %v842_v51 = vrot.slane %v835_v34, %v3174_v44 }
 0x1be   :  { %v591_v46 = vpack.i.b16 %v537_v39, %v512_v27  ;;  %v593_v47 = vshrl.u32 %v537_v39, 16  ;;  %v579_v52 = vrot.slane %v2555_v38, %v3172_v37  ;;  %v1270_v53 = vsel %vm1173_vm2, %v877_v40, 0  ;;  %v2667_v31 = vpop.f32.mrf.mxu0 }
 0x1bf   :  { %v538_v55 = vcombine.high %v537_v39, %v3024_v35  ;;  %v546_v56 = vrot.slane %v539_v42, %v3172_v37  ;;  %v554_v57 = vrot.slane %v2554_v43, %v3172_v37  ;;  %v1316_v58 = vsel %vm1173_vm2, %v880_v49, 0 }
 0x1c0   :  { %2672 = vmatmul.mubr.msk.bf16.vlgmr.msra.gmra.mxu1 %vm1173_vm2, %v591_v46  ;;  %v594_v54 = vpack.i.b16 %v593_v47, %v592_v45  ;;  %v513_v59 = vcombine.high %v512_v27, %v3024_v35  ;;  %v885_v60 = vshrl.u32 %v867_v48, 16  ;;  %v580_v61 = vcombine.low %v571_v50, %v579_v52  ;;  %v323_v33 = vpop.f32.mrf.mxu0 }
 0x1c1   :  { %2682 = vmatpush3.bf16.xpose.msra.mxu1 %v1270_v53  ;;  %2683 = vmatprep.mubr.msk.bf16.mxu1 %vm3018_vm0, %v3017_v0  ;;  %v883_v62 = vpack.i.b16 %v867_v48, %v842_v51  ;;  %v599_v63 = vshrl.u32 %v538_v55, 16  ;;  %v884_v1 = vshrl.u32 %v842_v51, 16  ;;  %v555_v2 = vcombine.low %v546_v56, %v554_v57 }
 0x1c2   :  { %2678 = vmatmul.mubr.msk.bf16.vlgmr.msra.gmra.mxu0 %vm1173_vm2, %v594_v54  ;;  %2693 = vmatprep.subr.bf16.mxu1 %v3017_v0  ;;  %v597_v3 = vpack.i.b16 %v538_v55, %v513_v59  ;;  %v598_v4 = vshrl.u32 %v513_v59, 16  ;;  %v868_v6 = vcombine.high %v867_v48, %v3024_v35  ;;  %v587_v9 = vrot.slane %v580_v61, %v3174_v44  ;;  %v2668_v38 = vpop.f32.mrf.mxu0 }
 0x1c3   :  { %2688 = vmatpush3.bf16.xpose.msra.mxu0 %v1316_v58  ;;  %2689 = vmatprep.mubr.msk.bf16.mxu0 %vm3018_vm0, %v3017_v0  ;;  %v886_v5 = vpack.i.b16 %v885_v60, %v884_v1  ;;  %v1362_v7 = vsel %vm1173_vm2, %v883_v62, 0  ;;  %v843_v10 = vcombine.high %v842_v51, %v3024_v35  ;;  %v562_v12 = vrot.slane %v555_v2, %v3174_v44 }
 0x1c4   :  { %2699 = vmatprep.subr.bf16.mxu0 %v3017_v0  ;;  %v600_v8 = vpack.i.b16 %v599_v63, %v598_v4  ;;  %v891_v13 = vshrl.u32 %v868_v6, 16  ;;  %v605_v15 = vshrl.u32 %v587_v9, 16  ;;  %v588_v22 = vcombine.high %v587_v9, %v3024_v35 }
 0x1c5   :  { %v1408_v11 = vsel %vm1173_vm2, %v886_v5, 0  ;;  %v889_v14 = vpack.i.b16 %v868_v6, %v843_v10  ;;  %v890_v16 = vshrl.u32 %v843_v10, 16  ;;  %v603_v17 = vpack.i.b16 %v587_v9, %v562_v12 }
 0x1c6   :  { %v604_v18 = vshrl.u32 %v562_v12, 16  ;;  %v563_v24 = vcombine.high %v562_v12, %v3024_v35  ;;  %v611_v25 = vshrl.u32 %v588_v22, 16  ;;  %v321_v32 = vadd.f32 %v2548_v29, %v320_v30 }
 0x1c7   :  { %v892_v19 = vpack.i.b16 %v891_v13, %v890_v16  ;;  %v1454_v20 = vsel %vm1173_vm2, %v889_v14, 0  ;;  %v324_v34 = vadd.f32 %v2548_v29, %v323_v33 }
 0x1c8   :  { %2684 = vmatmul.mubr.msk.bf16.vlgmr.msra.gmra.mxu1 %vm1173_vm2, %v597_v3  ;;  %v606_v21 = vpack.i.b16 %v605_v15, %v604_v18  ;;  %v609_v26 = vpack.i.b16 %v588_v22, %v563_v24  ;;  %v610_v27 = vshrl.u32 %v563_v24, 16 }
 0x1c9   :  { %2694 = vmatpush3.bf16.xpose.msra.mxu1 %v1362_v7  ;;  %2695 = vmatprep.mubr.msk.bf16.mxu1 %vm3018_vm0, %v3017_v0  ;;  %v1500_v23 = vsel %vm1173_vm2, %v892_v19, 0  ;;  %v3290_v39 = vpack.c.bf16 %v324_v34, %v321_v32 }
 0x1ca   :  { %2690 = vmatmul.mubr.msk.bf16.vlgmr.msra.gmra.mxu0 %vm1173_vm2, %v600_v8  ;;  %2705 = vmatprep.subr.bf16.mxu1 %v3017_v0  ;;  %v612_v28 = vpack.i.b16 %v611_v25, %v610_v27 }
 0x1cb   :  { %2700 = vmatpush3.bf16.xpose.msra.mxu0 %v1408_v11  ;;  %2701 = vmatprep.mubr.msk.bf16.mxu0 %vm3018_vm0, %v3017_v0 }
 0x1cc   :  { %2711 = vmatprep.subr.bf16.mxu0 %v3017_v0 }
 0x1d0   :  { %2696 = vmatmul.mubr.msk.bf16.vlgmr.msra.gmra.mxu1 %vm1173_vm2, %v603_v17 }
 0x1d1   :  { %2706 = vmatpush3.bf16.xpose.msra.mxu1 %v1454_v20  ;;  %2707 = vmatprep.mubr.msk.bf16.mxu1 %vm3018_vm0, %v3017_v0 }
 0x1d2   :  { %2702 = vmatmul.mubr.msk.bf16.vlgmr.msra.gmra.mxu0 %vm1173_vm2, %v606_v21  ;;  %2717 = vmatprep.subr.bf16.mxu1 %v3017_v0 }
 0x1d3   :  { %2712 = vmatpush3.bf16.xpose.msra.mxu0 %v1500_v23  ;;  %2713 = vmatprep.mubr.msk.bf16.mxu0 %vm3018_vm0, %v3017_v0 }
 0x1d4   :  { %2723 = vmatprep.subr.bf16.mxu0 %v3017_v0 }
 0x1d8   :  { %2708 = vmatmul.mubr.msk.bf16.vlgmr.msra.gmra.mxu1 %vm1173_vm2, %v609_v26 }
 0x1d9   :  { %2719 = vmatprep.mubr.msk.bf16.mxu1 %vm3018_vm0, %v3017_v0 }
 0x1da   :  { %2714 = vmatmul.mubr.msk.bf16.vlgmr.msra.gmra.mxu0 %vm1173_vm2, %v612_v28 }
 0x1db   :  { %2725 = vmatprep.mubr.msk.bf16.mxu0 %vm3018_vm0, %v3017_v0 }
 0x280   :  { %v1214_v40 = vpop.f32.mrf.mxu1 }
 0x281   :  { %v1542_v41 = vsel %vm1173_vm2, %v1214_v40, -inf }
 0x282   :  { %v1260_v42 = vpop.f32.mrf.mxu0  ;;  %1543 = vmax.xlane.f32.xlu0 %v1542_v41  ;;  %v2673_v43 = vpop.f32.mrf.mxu1 }
 0x283   :  { %v1545_v45 = vsel %vm1173_vm2, %v1260_v42, -inf }
 0x284   :  { %1546 = vmax.xlane.f32.xlu1 %v1545_v45  ;;  %v1217_v46 = vpop.f32.mrf.mxu1  ;;  %v2679_v47 = vpop.f32.mrf.mxu0 }
 0x286   :  { %v2674_v49 = vpop.f32.mrf.mxu1  ;;  %v1263_v48 = vpop.f32.mrf.mxu0 }
 0x288   :  { %v2680_v50 = vpop.f32.mrf.mxu0  ;;  %v1306_v51 = vpop.f32.mrf.mxu1 }
 0x289   :  { %v1548_v52 = vsel %vm1173_vm2, %v1306_v51, -inf }
 0x28a   :  { %v1352_v53 = vpop.f32.mrf.mxu0  ;;  %1549 = vmax.xlane.f32.xlu0 %v1548_v52  ;;  %v2685_v54 = vpop.f32.mrf.mxu1 }
 0x28b   :  { %v1551_v57 = vsel %vm1173_vm2, %v1352_v53, -inf }
 0x28c   :  { %v1309_v55 = vpop.f32.mrf.mxu1  ;;  %v2691_v56 = vpop.f32.mrf.mxu0 }
 0x28e   :  { %v1355_v58 = vpop.f32.mrf.mxu0  ;;  %1552 = vmax.xlane.f32.xlu0 %v1551_v57  ;;  %v2686_v59 = vpop.f32.mrf.mxu1 }
 0x290   :  { %v2692_v60 = vpop.f32.mrf.mxu0  ;;  %v1398_v61 = vpop.f32.mrf.mxu1 }
 0x291   :  { %v1554_v62 = vsel %vm1173_vm2, %v1398_v61, -inf }
 0x292   :  { %v1444_v63 = vpop.f32.mrf.mxu0  ;;  %1555 = vmax.xlane.f32.xlu1 %v1554_v62  ;;  %v2697_v1 = vpop.f32.mrf.mxu1 }
 0x293   :  { %v1557_v2 = vsel %vm1173_vm2, %v1444_v63, -inf }
 0x294   :  { %1558 = vmax.xlane.f32.xlu0 %v1557_v2  ;;  %v1401_v3 = vpop.f32.mrf.mxu1  ;;  %v2703_v4 = vpop.f32.mrf.mxu0 }
 0x296   :  { %v2698_v5 = vpop.f32.mrf.mxu1  ;;  %v1447_v6 = vpop.f32.mrf.mxu0 }
 0x297   :  { %v905_v6 = vshrl.u32 %v3290_v39, 16 }
 0x298   :  { %v2704_v7 = vpop.f32.mrf.mxu0  ;;  %v1490_v8 = vpop.f32.mrf.mxu1 }
 0x299   :  { %v1560_v9 = vsel %vm1173_vm2, %v1490_v8, -inf }
 0x29a   :  { %v1536_v10 = vpop.f32.mrf.mxu0  ;;  %1561 = vmax.xlane.f32.xlu1 %v1560_v9  ;;  %v2709_v11 = vpop.f32.mrf.mxu1 }
 0x29b   :  { %v1563_v12 = vsel %vm1173_vm2, %v1536_v10, -inf }
 0x29c   :  { %1564 = vmax.xlane.f32.xlu0 %v1563_v12  ;;  %v1493_v13 = vpop.f32.mrf.mxu1  ;;  %v2715_v14 = vpop.f32.mrf.mxu0 }
 0x29e   :  { %v2710_v15 = vpop.f32.mrf.mxu1  ;;  %v1539_v16 = vpop.f32.mrf.mxu0 }
 0x2a0   :  { %v2716_v17 = vpop.f32.mrf.mxu0 }
 0x2ab   :  { %895 = vrot.lane.b32.xlu1 %v3290_v39, %s3020_s3 }
 0x30b   :  { %v1544_v18 = vpop.xlane.xlu0 %1543 }
 0x30c   :  { %v1566_v19 = vsub.f32 %v1214_v40, %v1544_v18 }
 0x30d   :  { %v1547_v20 = vpop.xlane.xlu1 %1546 }
 0x30e   :  { %v1574_v21 = vmul.f32 1.442695, %v1566_v19  ;;  %v1567_v22 = vsub.f32 %v1260_v42, %v1547_v20 }
 0x310   :  { %2819 = vpow2.f32 %v1574_v21  ;;  %v1576_v23 = vmul.f32 1.442695, %v1567_v22 }
 0x312   :  { %2821 = vpow2.f32 %v1576_v23 }
 0x313   :  { %v1550_v28 = vpop.xlane.xlu0 %1549 }
 0x314   :  { %v1568_v30 = vsub.f32 %v1306_v51, %v1550_v28 }
 0x316   :  { %v1578_v34 = vmul.f32 1.442695, %v1568_v30 }
 0x317   :  { %v1553_v29 = vpop.xlane.xlu0 %1552 }
 0x318   :  { %v1569_v32 = vsub.f32 %v1352_v53, %v1553_v29  ;;  %2823 = vpow2.f32 %v1578_v34 }
 0x31a   :  { %v1580_v41 = vmul.f32 1.442695, %v1569_v32 }
 0x31b   :  { %v1556_v33 = vpop.xlane.xlu1 %1555 }
 0x31c   :  { %v1570_v42 = vsub.f32 %v1398_v61, %v1556_v33  ;;  %2825 = vpow2.f32 %v1580_v41 }
 0x31d   :  { %v3302_v24 = vpop.eup %2819  ;;  %v1559_v31 = vpop.xlane.xlu0 %1558 }
 0x31e   :  { %v1590_v25 = vsel %vm1173_vm2, %v3302_v24, 0.0  ;;  %v1571_v38 = vsub.f32 %v1444_v63, %v1559_v31  ;;  %v1582_v47 = vmul.f32 1.442695, %v1570_v42 }
 0x31f   :  { %v3306_v26 = vpop.eup %2821  ;;  %1591 = vadd.xlane.f32.xlu1 %v1590_v25 }
 0x320   :  { %v1593_v27 = vsel %vm1173_vm2, %v3306_v26, 0.0  ;;  %v1584_v45 = vmul.f32 1.442695, %v1571_v38 }
 0x321   :  { %1594 = vadd.xlane.f32.xlu0 %v1593_v27 }
 0x322   :  { %2827 = vpow2.f32 %v1584_v45 }
 0x323   :  { %v1562_v43 = vpop.xlane.xlu1 %1561  ;;  %2829 = vpow2.f32 %v1582_v47 }
 0x324   :  { %v1572_v49 = vsub.f32 %v1490_v8, %v1562_v43 }
 0x325   :  { %v1565_v40 = vpop.xlane.xlu0 %1564  ;;  %v3314_v51 = vpop.eup %2823 }
 0x326   :  { %v1573_v46 = vsub.f32 %v1536_v10, %v1565_v40  ;;  %v1586_v50 = vmul.f32 1.442695, %v1572_v49  ;;  %v1596_v53 = vsel %vm1173_vm2, %v3314_v51, 0.0 }
 0x327   :  { %v896_v63 = vpop.permute.xlu1 %895 }
 0x328   :  { %v1588_v48 = vmul.f32 1.442695, %v1573_v46  ;;  %v906_v3 = vshrl.u32 %v896_v63, 16  ;;  %v3339_v5 = vpack.i.b16 %v896_v63, %v3290_v39 }
 0x329   :  { %v3316_v52 = vpop.eup %2825 }
 0x32a   :  { %2831 = vpow2.f32 %v1588_v48  ;;  %v1599_v55 = vsel %vm1173_vm2, %v3316_v52, 0.0  ;;  %v3344_v11 = vpack.i.b16 %v906_v3, %v905_v6  ;;  %v924_v12 = vrot.slane %v3339_v5, %v3172_v37 }
 0x32b   :  { %2833 = vpow2.f32 %v1586_v50 }
 0x32c   :  { %v983_v6 = vcombine.high %v3344_v11, %v3170_v36 }
 0x32f   :  { %v3320_v54 = vpop.eup %2827 }
 0x330   :  { %899 = vrot.lane.b32.xlu1 %v3290_v39, %s3019_s1  ;;  %v3324_v56 = vpop.eup %2829  ;;  %v1605_v57 = vsel %vm1173_vm2, %v3320_v54, 0.0 }
 0x331   :  { %v1602_v59 = vsel %vm1173_vm2, %v3324_v56, 0.0 }
 0x337   :  { %897 = vrot.lane.b32.xlu0 %v3290_v39, %s3021_s6  ;;  %v3328_v58 = vpop.eup %2831  ;;  %v990_v39 = vrot.slane %v3344_v11, %v3172_v37 }
 0x338   :  { %v3332_v60 = vpop.eup %2833  ;;  %v1611_v61 = vsel %vm1173_vm2, %v3328_v58, 0.0 }
 0x339   :  { %v1608_v62 = vsel %vm1173_vm2, %v3332_v60, 0.0 }
 0x354   :  { %1597 = vadd.xlane.f32.xlu1 %v1596_v53 }
 0x356   :  { %1600 = vadd.xlane.f32.xlu0 %v1599_v55 }
 0x358   :  { %1606 = vadd.xlane.f32.xlu1 %v1605_v57 }
 0x35a   :  { %1603 = vadd.xlane.f32.xlu0 %v1602_v59 }
 0x35c   :  { %1612 = vadd.xlane.f32.xlu1 %v1611_v61 }
 0x35e   :  { %1609 = vadd.xlane.f32.xlu0 %v1608_v62 }
 0x3a8   :  { %v1592_v1 = vpop.xlane.xlu1 %1591 }
 0x3a9   :  { %2835 = vrcp.f32 %v1592_v1 }
 0x3aa   :  { %v1595_v2 = vpop.xlane.xlu0 %1594 }
 0x3ab   :  { %2837 = vrcp.f32 %v1595_v2 }
 0x3ac   :  { %v900_v4 = vpop.permute.xlu1 %899 }
 0x3ad   :  { %v914_v8 = vshrl.u32 %v900_v4, 16 }
 0x3ae   :  { %v898_v7 = vpop.permute.xlu0 %897 }
 0x3af   :  { %v3342_v9 = vpack.i.b16 %v900_v4, %v898_v7  ;;  %v913_v10 = vshrl.u32 %v898_v7, 16 }
 0x3b1   :  { %v3348_v13 = vpack.i.b16 %v914_v8, %v913_v10  ;;  %v939_v14 = vrot.slane %v3342_v9, %v3172_v37  ;;  %v932_v7 = vcombine.high %v3342_v9, %v3170_v36  ;;  %v917_v8 = vcombine.high %v3339_v5, %v3170_v36 }
 0x3b3   :  { %v947_v15 = vcombine.low %v924_v12, %v939_v14  ;;  %v948_v16 = vcombine.high %v924_v12, %v939_v14  ;;  %v1005_v17 = vrot.slane %v3348_v13, %v3172_v37  ;;  %v997_v12 = vrot.slane %v983_v6, %v3172_v37 }
 0x3b4   :  { %v931_v14 = vrot.slane %v917_v8, %v3172_v37 }
 0x3b5   :  { %v955_v18 = vrot.slane %v947_v15, %v3174_v44  ;;  %v962_v19 = vrot.slane %v948_v16, %v3174_v44  ;;  %v1013_v20 = vcombine.low %v990_v39, %v1005_v17  ;;  %v1014_v21 = vcombine.high %v990_v39, %v1005_v17 }
 0x3b6   :  { %v2836_v40 = vpop.eup %2835 }
 0x3b7   :  { %v1049_v22 = vcombine.low %v955_v18, %v962_v19  ;;  %v2560_v23 = vcombine.high %v955_v18, %v962_v19  ;;  %v1021_v25 = vrot.slane %v1013_v20, %v3174_v44  ;;  %v1028_v27 = vrot.slane %v1014_v21, %v3174_v44 }
 0x3b8   :  { %v2838_v43 = vpop.eup %2837  ;;  %v1622_v46 = vmul.f32 %v2836_v40, %v3302_v24 }
 0x3b9   :  { %v1056_v28 = vrot.slane %v1049_v22, %v3172_v37  ;;  %v1064_v29 = vrot.slane %v2560_v23, %v3172_v37  ;;  %v1074_v30 = vcombine.low %v1021_v25, %v1028_v27  ;;  %v2561_v31 = vcombine.high %v1021_v25, %v1028_v27 }
 0x3ba   :  { %v1623_v53 = vmul.f32 %v2838_v43, %v3306_v26  ;;  %v1630_v1 = vpack.c.bf16 %v1622_v46, %v1622_v46  ;;  %v998_v26 = vcombine.high %v3348_v13, %v3170_v36  ;;  %v946_v13 = vrot.slane %v932_v7, %v3172_v37 }
 0x3bb   :  { %v1065_v32 = vcombine.low %v1056_v28, %v1064_v29  ;;  %v1081_v33 = vrot.slane %v1074_v30, %v3172_v37  ;;  %v1089_v34 = vrot.slane %v2561_v31, %v3172_v37 }
 0x3bc   :  { %v1631_v3 = vpack.c.bf16 %v1623_v53, %v1623_v53  ;;  %v1012_v10 = vrot.slane %v998_v26, %v3172_v37  ;;  %v963_v39 = vcombine.low %v931_v14, %v946_v13  ;;  %v964_v11 = vcombine.high %v931_v14, %v946_v13 }
 0x3bd   :  { %v1072_v38 = vrot.slane %v1065_v32, %v3174_v44  ;;  %v1090_v41 = vcombine.low %v1081_v33, %v1089_v34 }
 0x3be   :  { %v1029_v15 = vcombine.low %v997_v12, %v1012_v10  ;;  %v1030_v16 = vcombine.high %v997_v12, %v1012_v10  ;;  %v971_v18 = vrot.slane %v963_v39, %v3174_v44  ;;  %v978_v36 = vrot.slane %v964_v11, %v3174_v44 }
 0x3bf   :  { %v1073_v42 = vcombine.high %v1072_v38, %v3024_v35  ;;  %v1097_v45 = vrot.slane %v1090_v41, %v3174_v44  ;;  %v1152_v49 = vshrl.u32 %v1072_v38, 16 }
 0x3c0   :  { %v1037_v17 = vrot.slane %v1029_v15, %v3174_v44  ;;  %v1044_v9 = vrot.slane %v1030_v16, %v3174_v44  ;;  %v1099_v20 = vcombine.low %v971_v18, %v978_v36  ;;  %v2562_v21 = vcombine.high %v971_v18, %v978_v36 }
 0x3c1   :  { %v1151_v47 = vpack.i.b16 %v1097_v45, %v1072_v38  ;;  %v1153_v48 = vshrl.u32 %v1097_v45, 16  ;;  %v1098_v50 = vcombine.high %v1097_v45, %v3024_v35  ;;  %v1158_v55 = vshrl.u32 %v1073_v42, 16 }
 0x3c2   :  { %v1124_v5 = vcombine.low %v1037_v17, %v1044_v9  ;;  %v2563_v19 = vcombine.high %v1037_v17, %v1044_v9  ;;  %v1106_v28 = vrot.slane %v1099_v20, %v3172_v37  ;;  %v1114_v29 = vrot.slane %v2562_v21, %v3172_v37 }
 0x3c3   :  { %v1643_v57 = vsel %vm1641_vm3, %v1151_v47, 0  ;;  %v1154_v59 = vpack.i.b16 %v1153_v48, %v1152_v49  ;;  %v1157_v61 = vpack.i.b16 %v1098_v50, %v1073_v42  ;;  %v1159_v62 = vshrl.u32 %v1098_v50, 16 }
 0x3c4   :  { %2718 = vmatpush3.bf16.msra.mxu1 %v1643_v57  ;;  %v1131_v23 = vrot.slane %v1124_v5, %v3172_v37  ;;  %v1139_v25 = vrot.slane %v2563_v19, %v3172_v37  ;;  %v1115_v33 = vcombine.low %v1106_v28, %v1114_v29 }
 0x3c5   :  { %v1689_v63 = vsel %vm1641_vm3, %v1154_v59, 0  ;;  %2729 = vmatprep.subr.bf16.mxu1 %v3017_v0  ;;  %v1160_v24 = vpack.i.b16 %v1159_v62, %v1158_v55  ;;  %v1735_v2 = vsel %vm1641_vm3, %v1157_v61, 0 }
 0x3c6   :  { %2724 = vmatpush3.bf16.msra.mxu0 %v1689_v63  ;;  %v1140_v31 = vcombine.low %v1131_v23, %v1139_v25  ;;  %v1122_v40 = vrot.slane %v1115_v33, %v3174_v44 }
 0x3c7   :  { %2720 = vmatmul.mubr.msk.bf16.vlgmr.msra.gmra.mxu1 %vm1173_vm2, %v1630_v1  ;;  %2735 = vmatprep.subr.bf16.mxu0 %v3017_v0  ;;  %v1781_v4 = vsel %vm1641_vm3, %v1160_v24, 0 }
 0x3c8   :  { %2730 = vmatpush3.bf16.msra.mxu1 %v1735_v2  ;;  %2731 = vmatprep.mubr.msk.bf16.mxu1 %vm3018_vm0, %v3017_v0  ;;  %v1147_v34 = vrot.slane %v1140_v31, %v3174_v44  ;;  %v1164_v47 = vshrl.u32 %v1122_v40, 16  ;;  %v1123_v62 = vcombine.high %v1122_v40, %v3024_v35 }
 0x3c9   :  { %2726 = vmatmul.mubr.msk.bf16.vlgmr.msra.gmra.mxu0 %vm1173_vm2, %v1631_v3  ;;  %2741 = vmatprep.subr.bf16.mxu1 %v3017_v0 }
 0x3ca   :  { %2736 = vmatpush3.bf16.msra.mxu0 %v1781_v4  ;;  %2737 = vmatprep.mubr.msk.bf16.mxu0 %vm3018_vm0, %v3017_v0  ;;  %v1165_v42 = vshrl.u32 %v1147_v34, 16  ;;  %v1163_v46 = vpack.i.b16 %v1147_v34, %v1122_v40  ;;  %v1148_v55 = vcombine.high %v1147_v34, %v3024_v35  ;;  %v1170_v2 = vshrl.u32 %v1123_v62, 16 }
 0x3cb   :  { %2747 = vmatprep.subr.bf16.mxu0 %v3017_v0 }
 0x3cc   :  { %v1166_v53 = vpack.i.b16 %v1165_v42, %v1164_v47  ;;  %v1827_v59 = vsel %vm1641_vm3, %v1163_v46, 0  ;;  %v1171_v1 = vshrl.u32 %v1148_v55, 16  ;;  %v1169_v24 = vpack.i.b16 %v1148_v55, %v1123_v62 }
 0x3ce   :  { %v1172_v26 = vpack.i.b16 %v1171_v1, %v1170_v2  ;;  %v1919_v6 = vsel %vm1641_vm3, %v1169_v24, 0 }
 0x3d0   :  { %v1965_v8 = vsel %vm1641_vm3, %v1172_v26, 0 }
 0x3dd   :  { %v1598_v22 = vpop.xlane.xlu1 %1597 }
 0x3de   :  { %2839 = vrcp.f32 %v1598_v22 }
 0x3df   :  { %v1601_v27 = vpop.xlane.xlu0 %1600 }
 0x3e0   :  { %2841 = vrcp.f32 %v1601_v27 }
 0x3e1   :  { %v1607_v30 = vpop.xlane.xlu1 %1606 }
 0x3e2   :  { %2843 = vrcp.f32 %v1607_v30 }
 0x3e3   :  { %v1604_v32 = vpop.xlane.xlu0 %1603 }
 0x3e4   :  { %2845 = vrcp.f32 %v1604_v32 }
 0x3e5   :  { %v1613_v41 = vpop.xlane.xlu1 %1612 }
 0x3e7   :  { %v1610_v38 = vpop.xlane.xlu0 %1609 }
 0x3e8   :  { %2847 = vrcp.f32 %v1610_v38 }
 0x3e9   :  { %2849 = vrcp.f32 %v1613_v41 }
 0x3eb   :  { %v2840_v43 = vpop.eup %2839 }
 0x3ec   :  { %v1624_v45 = vmul.f32 %v2840_v43, %v3314_v51  ;;  %v1873_v51 = vsel %vm1641_vm3, %v1166_v53, 0 }
 0x3ed   :  { %v2842_v49 = vpop.eup %2841 }
 0x3ee   :  { %v1632_v48 = vpack.c.bf16 %v1624_v45, %v1624_v45  ;;  %v1625_v50 = vmul.f32 %v2842_v49, %v3316_v52 }
 0x3ef   :  { %v2844_v57 = vpop.eup %2843 }
 0x3f0   :  { %2732 = vmatmul.mubr.msk.bf16.vlgmr.msra.gmra.mxu1 %vm1173_vm2, %v1632_v48  ;;  %v1633_v61 = vpack.c.bf16 %v1625_v50, %v1625_v50  ;;  %v1627_v35 = vmul.f32 %v2844_v57, %v3320_v54 }
 0x3f1   :  { %v2846_v63 = vpop.eup %2845  ;;  %2742 = vmatpush3.bf16.msra.mxu1 %v1827_v59  ;;  %2743 = vmatprep.mubr.msk.bf16.mxu1 %vm3018_vm0, %v3017_v0 }
 0x3f2   :  { %2738 = vmatmul.mubr.msk.bf16.vlgmr.msra.gmra.mxu0 %vm1173_vm2, %v1633_v61  ;;  %2753 = vmatprep.subr.bf16.mxu1 %v3017_v0  ;;  %v1626_v52 = vmul.f32 %v2846_v63, %v3324_v56  ;;  %v1635_v7 = vpack.c.bf16 %v1627_v35, %v1627_v35 }
 0x3f3   :  { %2748 = vmatpush3.bf16.msra.mxu0 %v1873_v51  ;;  %2749 = vmatprep.mubr.msk.bf16.mxu0 %vm3018_vm0, %v3017_v0 }
 0x3f4   :  { %2759 = vmatprep.subr.bf16.mxu0 %v3017_v0  ;;  %v1634_v3 = vpack.c.bf16 %v1626_v52, %v1626_v52 }
 0x3f5   :  { %v2848_v4 = vpop.eup %2847 }
 0x3f6   :  { %v2850_v56 = vpop.eup %2849  ;;  %v1628_v54 = vmul.f32 %v2848_v4, %v3332_v60 }
 0x3f7   :  { %v1629_v10 = vmul.f32 %v2850_v56, %v3328_v58 }
 0x3f8   :  { %2744 = vmatmul.mubr.msk.bf16.vlgmr.msra.gmra.mxu1 %vm1173_vm2, %v1634_v3  ;;  %v1636_v12 = vpack.c.bf16 %v1628_v54, %v1628_v54 }
 0x3f9   :  { %2754 = vmatpush3.bf16.msra.mxu1 %v1919_v6  ;;  %2755 = vmatprep.mubr.msk.bf16.mxu1 %vm3018_vm0, %v3017_v0  ;;  %v1637_v13 = vpack.c.bf16 %v1629_v10, %v1629_v10 }
 0x3fa   :  { %2750 = vmatmul.mubr.msk.bf16.vlgmr.msra.gmra.mxu0 %vm1173_vm2, %v1635_v7  ;;  %2765 = vmatprep.subr.bf16.mxu1 %v3017_v0 }
 0x3fb   :  { %2760 = vmatpush3.bf16.msra.mxu0 %v1965_v8  ;;  %2761 = vmatprep.mubr.msk.bf16.mxu0 %vm3018_vm0, %v3017_v0 }
 0x3fc   :  { %2773 = vmatprep.subr.bf16.mxu0 %v3017_v0 }
 0x400   :  { %2756 = vmatmul.mubr.msk.bf16.vlgmr.msra.gmra.mxu1 %vm1173_vm2, %v1636_v12 }
 0x401   :  { %2769 = vmatprep.mubr.msk.bf16.mxu1 %vm3018_vm0, %v3017_v0 }
 0x402   :  { %2762 = vmatmul.mubr.msk.bf16.vlgmr.msra.gmra.mxu0 %vm1173_vm2, %v1637_v13 }
 0x403   :  { %2781 = vmatprep.mubr.msk.bf16.mxu0 %vm3018_vm0, %v3017_v0 }
 0x487   :  { %v1679_v60 = vpop.f32.mrf.mxu1 }
 0x489   :  { %v2721_v14 = vpop.f32.mrf.mxu1  ;;  %v1725_v15 = vpop.f32.mrf.mxu0 }
 0x48b   :  { %v1682_v16 = vpop.f32.mrf.mxu1  ;;  %v2727_v39 = vpop.f32.mrf.mxu0 }
 0x48d   :  { %v2722_v58 = vpop.f32.mrf.mxu1  ;;  %v1728_v11 = vpop.f32.mrf.mxu0 }
 0x48f   :  { %v2728_v17 = vpop.f32.mrf.mxu0 }
 0x4b0   :  { %v1771_v9 = vpop.f32.mrf.mxu1 }
 0x4b1   :  { %v2007_v18 = vcombine.low %v1679_v60, %v1771_v9  ;;  %v2008_v36 = vcombine.high %v1679_v60, %v1771_v9 }
 0x4b2   :  { %v2733_v5 = vpop.f32.mrf.mxu1  ;;  %v1817_v19 = vpop.f32.mrf.mxu0 }
 0x4b3   :  { %v2023_v20 = vcombine.low %v1725_v15, %v1817_v19  ;;  %v2024_v21 = vcombine.high %v1725_v15, %v1817_v19  ;;  %v2015_v25 = vrot.slane %v2007_v18, %v3172_v37  ;;  %v2022_v27 = vrot.slane %v2008_v36, %v3172_v37 }
 0x4b4   :  { %v1774_v22 = vpop.f32.mrf.mxu1  ;;  %v2739_v23 = vpop.f32.mrf.mxu0 }
 0x4b5   :  { %v2031_v28 = vrot.slane %v2023_v20, %v3172_v37  ;;  %v2038_v29 = vrot.slane %v2024_v21, %v3172_v37 }
 0x4b6   :  { %v2734_v30 = vpop.f32.mrf.mxu1  ;;  %v1820_v31 = vpop.f32.mrf.mxu0 }
 0x4b7   :  { %v2039_v32 = vcombine.low %v2015_v25, %v2031_v28  ;;  %v2040_v33 = vcombine.high %v2015_v25, %v2031_v28  ;;  %v2055_v34 = vcombine.low %v2022_v27, %v2038_v29  ;;  %v2056_v38 = vcombine.high %v2022_v27, %v2038_v29  ;;  %v2813_v27 = vld [vmem:[#allocation10 + $0x8] sm:$0xff]  }
 0x4b8   :  { %v2740_v40 = vpop.f32.mrf.mxu0  ;;  %v1863_v41 = vpop.f32.mrf.mxu1  ;;  %2766 = vmatpush3.bf16.msra.mxu1 %v2813_v27 }
 0x4b9   :  { %v2047_v42 = vrot.slane %v2039_v32, %v3174_v44  ;;  %v2054_v43 = vrot.slane %v2040_v33, %v3174_v44  ;;  %v2063_v45 = vrot.slane %v2055_v34, %v3174_v44  ;;  %v2070_v46 = vrot.slane %v2056_v38, %v3174_v44  ;;  %2767 = vmatprep.subr.bf16.mxu1 %v3017_v0 }
 0x4ba   :  { %v2745_v47 = vpop.f32.mrf.mxu1  ;;  %v1909_v49 = vpop.f32.mrf.mxu0 }
 0x4bb   :  { %v2143_v48 = vcombine.low %v2047_v42, %v2054_v43  ;;  %v2580_v50 = vcombine.high %v2047_v42, %v2054_v43  ;;  %v2159_v53 = vcombine.low %v2063_v45, %v2070_v46  ;;  %v2581_v55 = vcombine.high %v2063_v45, %v2070_v46  ;;  %v2814_v45 = vld [vmem:[#allocation10] sm:$0xff]  }
 0x4bc   :  { %v1866_v57 = vpop.f32.mrf.mxu1  ;;  %v2751_v59 = vpop.f32.mrf.mxu0  ;;  %2768 = vmatpush3.bf16.msra.mxu1 %v2814_v45 }
 0x4bd   :  { %v2150_v61 = vrot.slane %v2143_v48, %v3172_v37  ;;  %v2158_v62 = vrot.slane %v2580_v50, %v3172_v37  ;;  %v2166_v63 = vrot.slane %v2159_v53, %v3172_v37  ;;  %v2174_v51 = vrot.slane %v2581_v55, %v3172_v37 }
 0x4be   :  { %v2746_v52 = vpop.f32.mrf.mxu1  ;;  %v1912_v1 = vpop.f32.mrf.mxu0 }
 0x4bf   :  { %v2176_v24 = vcombine.high %v2150_v61, %v2158_v62  ;;  %v2192_v35 = vcombine.high %v2166_v63, %v2174_v51  ;;  %v2175_v2 = vcombine.low %v2150_v61, %v2158_v62  ;;  %v2191_v3 = vcombine.low %v2166_v63, %v2174_v51 }
 0x4c0   :  { %v2752_v26 = vpop.f32.mrf.mxu0  ;;  %v1955_v4 = vpop.f32.mrf.mxu1 }
 0x4c1   :  { %v2075_v6 = vcombine.low %v1863_v41, %v1955_v4  ;;  %v2076_v7 = vcombine.high %v1863_v41, %v1955_v4  ;;  %v2190_v56 = vrot.slane %v2176_v24, %v3174_v44  ;;  %v2206_v8 = vrot.slane %v2192_v35, %v3174_v44 }
 0x4c2   :  { %v2757_v54 = vpop.f32.mrf.mxu1  ;;  %v2001_v10 = vpop.f32.mrf.mxu0  ;;  %v3455_v12 = vrot.slane %v2175_v2, %v3174_v44  ;;  %v3458_v13 = vrot.slane %v2191_v3, %v3174_v44 }
 0x4c3   :  { %v2091_v60 = vcombine.low %v1909_v49, %v2001_v10  ;;  %v2092_v14 = vcombine.high %v1909_v49, %v2001_v10  ;;  %v2209_v39 = vcombine.low %v2190_v56, %v2206_v8  ;;  %v2083_v17 = vrot.slane %v2075_v6, %v3172_v37  ;;  %v2816_v54 = vld [vmem:[%s3531_s9 + $0x10] sm:$0xff]   ;;  %v2817_v10 = vld [vmem:[%s3531_s9 + $0x8] sm:$0xff]  }
 0x4c4   :  { %v1958_v15 = vpop.f32.mrf.mxu1  ;;  %v2763_v16 = vpop.f32.mrf.mxu0  ;;  %v2208_v58 = vcombine.high %v3455_v12, %v3458_v13  ;;  %v2207_v11 = vcombine.low %v3455_v12, %v3458_v13  ;;  %v2090_v9 = vrot.slane %v2076_v7, %v3172_v37  ;;  %v2210_v63 = vcombine.high %v2190_v56, %v2206_v8  ;;  %v2815_v8 = vld [vmem:[%s3531_s9 + $0x18] sm:$0xff]   ;;  %v2818_v12 = vld [vmem:[%s3531_s9] sm:$0xff]  }
 0x4c5   :  { %v2099_v18 = vrot.slane %v2091_v60, %v3172_v37  ;;  %v2106_v36 = vrot.slane %v2092_v14, %v3172_v37  ;;  %2289 = vrot.lane.b32.xlu1 %v2209_v39, %s3025_s5  ;;  %2774 = vmatpush3.bf16.msra.mxu0 %v2815_v8  ;;  %v2584_v13 = vld [vmem:[#allocation11] ss:$0 sm:$0xff] }
 0x4c6   :  { %2281 = vrot.lane.b32.xlu0 %v2208_v58, %s3026_s15  ;;  %v2758_v5 = vpop.f32.mrf.mxu1  ;;  %v2004_v19 = vpop.f32.mrf.mxu0  ;;  %2775 = vmatprep.subr.bf16.mxu0 %v3017_v0 }
 0x4c7   :  { %v2107_v20 = vcombine.low %v2083_v17, %v2099_v18  ;;  %v2108_v21 = vcombine.high %v2083_v17, %v2099_v18  ;;  %v2123_v22 = vcombine.low %v2090_v9, %v2106_v36  ;;  %v2124_v23 = vcombine.high %v2090_v9, %v2106_v36 }
 0x4c8   :  { %v2764_v25 = vpop.f32.mrf.mxu0 }
 0x4c9   :  { %v2115_v28 = vrot.slane %v2107_v20, %v3174_v44  ;;  %v2122_v29 = vrot.slane %v2108_v21, %v3174_v44  ;;  %v2131_v30 = vrot.slane %v2123_v22, %v3174_v44  ;;  %v2138_v31 = vrot.slane %v2124_v23, %v3174_v44  ;;  %2776 = vmatpush3.bf16.msra.mxu0 %v2816_v54  ;;  %v2588_v23 = vld [vmem:[%s3532_s10] ss:$0 sm:$0xff] }
 0x4ca   :  { %2777 = vmatprep.subr.bf16.mxu0 %v3017_v0 }
 0x4cb   :  { %v2211_v32 = vcombine.low %v2115_v28, %v2122_v29  ;;  %v2582_v33 = vcombine.high %v2115_v28, %v2122_v29  ;;  %v2227_v34 = vcombine.low %v2131_v30, %v2138_v31  ;;  %v2583_v38 = vcombine.high %v2131_v30, %v2138_v31 }
 0x4cd   :  { %v2218_v40 = vrot.slane %v2211_v32, %v3172_v37  ;;  %v2226_v41 = vrot.slane %v2582_v33, %v3172_v37  ;;  %v2234_v42 = vrot.slane %v2227_v34, %v3172_v37  ;;  %v2242_v43 = vrot.slane %v2583_v38, %v3172_v37  ;;  %2778 = vmatpush3.bf16.msra.mxu0 %v2817_v10 }
 0x4ce   :  { %2779 = vmatprep.subr.bf16.mxu0 %v3017_v0 }
 0x4cf   :  { %v2244_v46 = vcombine.high %v2218_v40, %v2226_v41  ;;  %v2260_v47 = vcombine.high %v2234_v42, %v2242_v43  ;;  %v2243_v49 = vcombine.low %v2218_v40, %v2226_v41  ;;  %v2259_v48 = vcombine.low %v2234_v42, %v2242_v43 }
 0x4d1   :  { %v2258_v50 = vrot.slane %v2244_v46, %v3174_v44  ;;  %v2274_v53 = vrot.slane %v2260_v47, %v3174_v44  ;;  %v2251_v55 = vrot.slane %v2243_v49, %v3174_v44  ;;  %v2267_v57 = vrot.slane %v2259_v48, %v3174_v44  ;;  %2780 = vmatpush3.bf16.msra.mxu0 %v2818_v12 }
 0x4d3   :  { %v2277_v59 = vcombine.low %v2258_v50, %v2274_v53  ;;  %v2276_v61 = vcombine.high %v2251_v55, %v2267_v57  ;;  %v2275_v62 = vcombine.low %v2251_v55, %v2267_v57  ;;  %v2278_v37 = vcombine.high %v2258_v50, %v2274_v53 }
 0x4d5   :  { %2291 = vrot.lane.b32.xlu0 %v2277_v59, %s3025_s5  ;;  %2283 = vrot.lane.b32.xlu1 %v2276_v61, %s3026_s15 }
 0x4d9   :  { %2299 = vrot.lane.b32.xlu0 %v2278_v37, %s3027_s16  ;;  %2297 = vrot.lane.b32.xlu1 %v2210_v63, %s3027_s16  ;;  %v2594_v63 = vld [vmem:[%s3533_s11] ss:$0 sm:$0xff] }
 0x537   :  { %v2290_v51 = vpop.permute.xlu1 %2289 }
 0x538   :  { %v2282_v52 = vpop.permute.xlu0 %2281 }
 0x539   :  { %v2303_v35 = vsel %vm1173_vm2, %v2207_v11, %v2282_v52  ;;  %v2595_v52 = vld [vmem:[%s3534_s12] ss:$0 sm:$0xff] }
 0x53a   :  { %v2306_v26 = vsel %vm2305_vm4, %v2303_v35, %v2290_v51 }
 0x547   :  { %v2292_v1 = vpop.permute.xlu0 %2291  ;;  %v2284_v24 = vpop.permute.xlu1 %2283 }
 0x548   :  { %v2304_v44 = vsel %vm1173_vm2, %v2275_v62, %v2284_v24 }
 0x549   :  { %v2307_v3 = vsel %vm2305_vm4, %v2304_v44, %v2292_v1 }
 0x54b   :  { %v2300_v2 = vpop.permute.xlu0 %2299  ;;  %v2298_v4 = vpop.permute.xlu1 %2297 }
 0x54c   :  { %v2310_v6 = vsel %vm2308_vm5, %v2307_v3, %v2300_v2  ;;  %v2309_v7 = vsel %vm2308_vm5, %v2306_v26, %v2298_v4 }
 0x54d   :  { %v2311_v56 = vpack.c.bf16 %v2310_v6, %v2309_v7 }
 0x54f   :  { %2770 = vmatmul.mubr.msk.bf16.vlgmr.msra.gmra.mxu1 %vm156_vm1, %v2311_v56 }
 0x60f   :  { %v2371_v60 = vpop.f32.mrf.mxu1 }
 0x610   :  { %v2372_v14 = vadd.f32 %v2584_v13, %v2371_v60 }
 0x611   :  { %v2771_v15 = vpop.f32.mrf.mxu1 }
 0x612   :  { %v2380_v16 = vmul.f32 0.70710677, %v2372_v14  ;;  %v2378_v5 = vmul.f32 0.5, %v2372_v14 }
 0x613   :  { %v2374_v39 = vpop.f32.mrf.mxu1 }
 0x614   :  { %2851 = verf.f32 %v2380_v16  ;;  %v2375_v58 = vadd.f32 %v2584_v13, %v2374_v39 }
 0x615   :  { %v2772_v11 = vpop.f32.mrf.mxu1 }
 0x616   :  { %v2381_v17 = vmul.f32 0.70710677, %v2375_v58  ;;  %v2379_v19 = vmul.f32 0.5, %v2375_v58 }
 0x618   :  { %2853 = verf.f32 %v2381_v17 }
 0x621   :  { %v2852_v9 = vpop.eup %2851 }
 0x622   :  { %v2384_v18 = vadd.f32 1.0, %v2852_v9 }
 0x624   :  { %v2386_v21 = vmul.f32 %v2384_v18, %v2378_v5 }
 0x625   :  { %v2854_v36 = vpop.eup %2853 }
 0x626   :  { %v2385_v20 = vadd.f32 1.0, %v2854_v36 }
 0x628   :  { %v2387_v0 = vmul.f32 %v2385_v20, %v2379_v19 }
 0x62a   :  { %v2388_v22 = vpack.c.bf16 %v2387_v0, %v2386_v21 }
 0x62c   :  { %2782 = vmatmul.mubr.msk.bf16.vlgmr.msra.gmra.mxu0 %vm2427_vm6, %v2388_v22 }
 0x6ec   :  { %v2465_v25 = vpop.f32.mrf.mxu0 }
 0x6ed   :  { %v2466_v27 = vadd.f32 %v2588_v23, %v2465_v25 }
 0x6ee   :  { %v2783_v28 = vpop.f32.mrf.mxu0 }
 0x6ef   :  { %v2472_v29 = vadd.f32 %v2466_v27, %v2309_v7 }
 0x6f0   :  { %v2468_v30 = vpop.f32.mrf.mxu0 }
 0x6f1   :  { %v2469_v31 = vadd.f32 %v2588_v23, %v2468_v30  ;;  %v2474_v32 = vsel %vm156_vm1, %v2472_v29, 0.0 }
 0x6f2   :  { %2475 = vadd.xlane.f32.xlu1 %v2474_v32  ;;  %v2784_v33 = vpop.f32.mrf.mxu0 }
 0x6f3   :  { %v2473_v34 = vadd.f32 %v2469_v31, %v2310_v6 }
 0x6f5   :  { %v2477_v38 = vsel %vm156_vm1, %v2473_v34, 0.0 }
 0x6f6   :  { %2478 = vadd.xlane.f32.xlu0 %v2477_v38 }
 0x77b   :  { %v2476_v40 = vpop.xlane.xlu1 %2475 }
 0x77c   :  { %v2481_v41 = vmul.f32 0.03125, %v2476_v40 }
 0x77e   :  { %v2483_v42 = vsub.f32 %v2472_v29, %v2481_v41 }
 0x77f   :  { %v2479_v43 = vpop.xlane.xlu0 %2478 }
 0x780   :  { %v2482_v45 = vmul.f32 0.03125, %v2479_v43  ;;  %v2485_v46 = vmul.f32 %v2483_v42, %v2483_v42 }
 0x782   :  { %v2484_v47 = vsub.f32 %v2473_v34, %v2482_v45  ;;  %v2487_v49 = vsel %vm156_vm1, %v2485_v46, 0.0 }
 0x783   :  { %2488 = vadd.xlane.f32.xlu0 %v2487_v49 }
 0x784   :  { %v2486_v48 = vmul.f32 %v2484_v47, %v2484_v47 }
 0x786   :  { %v2490_v50 = vsel %vm156_vm1, %v2486_v48, 0.0 }
 0x787   :  { %2491 = vadd.xlane.f32.xlu1 %v2490_v50 }
 0x80c   :  { %v2489_v53 = vpop.xlane.xlu0 %2488 }
 0x80d   :  { %v2493_v55 = vmul.f32 0.03125, %v2489_v53 }
 0x80f   :  { %v2495_v57 = vadd.f32 1e-05, %v2493_v55 }
 0x810   :  { %v2492_v59 = vpop.xlane.xlu1 %2491 }
 0x811   :  { %2855 = vrsqrt.f32 %v2495_v57  ;;  %v2494_v61 = vmul.f32 0.03125, %v2492_v59 }
 0x813   :  { %v2496_v62 = vadd.f32 1e-05, %v2494_v61 }
 0x815   :  { %2857 = vrsqrt.f32 %v2496_v62 }
 0x81e   :  { %v2856_v37 = vpop.eup %2855 }
 0x81f   :  { %v2499_v51 = vmul.f32 %v2856_v37, %v2483_v42 }
 0x821   :  { %v2507_v1 = vmul.f32 %v2594_v63, %v2499_v51 }
 0x822   :  { %v2858_v24 = vpop.eup %2857 }
 0x823   :  { %v2500_v35 = vmul.f32 %v2858_v24, %v2484_v47  ;;  %v2515_v44 = vadd.f32 %v2595_v52, %v2507_v1 }
 0x825   :  { %v2508_v2 = vmul.f32 %v2594_v63, %v2500_v35  ;;  %2517 = vst.msk [vmem:[#allocation13] sm:$0xff] %vm156_vm1, %v2515_v44 }
 0x827   :  { %v2516_v3 = vadd.f32 %v2595_v52, %v2508_v2 }
 0x829   :  { %2518 = vst.msk [vmem:[#allocation13 + $0x8] sm:$0xff] %vm156_vm1, %v2516_v3 }
 0x82a   :  { %2990 = shalt.err (!%p2987_p6)
}
 0x82b   :  { %s3029_s11 = smov 128  }
 0x82c   :  { %2530 = dma.vmem_to_hbm [thread:$0]  %s2525_s25, 256, %s3535_s13, [#allocation4], %s3029_s11, %s3029_s11, %s3026_s15  }
 0x82d   :  { %3007 = dma.done.wait [#allocation4], 256  }
 0x82e   :  { %3008 = vsyncadd [#allocation4], 4294967040 }
 0x82f   :  { %2534 = vsyncpa [#allocation3], 1 }
 0x830   :  { %2535 = vsyncpa [#allocation6], 1 }
 0x831   :  { %2536 = vsyncpa [#allocation9], 1 }
 0x832   :  { %2537 = vsyncpa [#allocation12], 1 }
 0x833   :  { %2538 = vsyncpa [#allocation4], 1 }

</bundles_post_ra>
